<compile_context>
chip_gen: v7x
topology: tpu7x:2x2x1
jax: 0.10.0
libtpu: 0.0.40
codegen_flags: <defaults>
</compile_context>

<pallas_src>
import functools

import jax
import jax.numpy as jnp
from jax.experimental import pallas as pl
from jax.experimental.pallas import tpu as pltpu

# Set _ACT_DTYPE to jnp.bfloat16 on v6e/v7x to halve activation DMA bytes and
# VMEM tiles (matmul accumulation stays f32; LN / gating math stays f32).
_ACT_DTYPE = jnp.float32
# MXU input precision (bf16 doubles MXU rate on v6e/v7x; kernel is DMA-bound so
# f32 default keeps reference numerics).
_MM_DTYPE = jnp.float32

# Rows per grid step.  512 fits comfortably in v7x's 32 MiB scoped VMEM even
# with 128-lane padding of the 56/57-wide blocks (~0.5 KiB/row/operand, ~4 MiB
# double-buffered inputs + ~1.5 MiB scratch).  On v5e/v6e (128 MiB VMEM) this
# can be raised to 1024 for very long node lists.
_MAX_TILE = 512
_TARGET_BLOCKS = 4       # keep >= a few grid steps so v7x's 2 TCs both work


def _pick_tile(n):
    t = -(-n // _TARGET_BLOCKS)          # cdiv
    t = ((t + 7) // 8) * 8               # sublane aligned
    return int(max(8, min(_MAX_TILE, t)))


# ----------------------------- in-kernel GVP helpers -----------------------------

def _gvp_core(mm, s_terms, pos_term, v_terms, w_dot_s, b_s, w_v, h, act):
    """GVPLinear (vi>0, vo>0, vector_gate=False) on already-loaded VMEM values.

    s_terms:  list of (x (T, w), W (w, so)) matmul terms of ws.
    pos_term: None or (col (T, 1), row (1, so)) -- VPU outer product.
    v_terms:  list of ((vx, vy, vz), Wlrh (w, 3h)) per vector-input chunk,
              Wlrh = [wl | wr | wh] packed column-wise.
    w_dot_s = wo @ ws_vn (folded), b_s = bo @ ws_vn + bs.
    """
    lrh = [None, None, None]
    for planes, w in v_terms:
        for c in range(3):
            t = mm(planes[c], w)
            lrh[c] = t if lrh[c] is None else lrh[c] + t
    dot = None
    vh = []
    for c in range(3):
        left, right = lrh[c][:, :h], lrh[c][:, h:2 * h]
        vh.append(lrh[c][:, 2 * h:])
        d = left * right
        dot = d if dot is None else dot + d                 # sum over 3 coords
    s = mm(dot, w_dot_s) + b_s
    for x, w in s_terms:
        s = s + mm(x, w)
    if pos_term is not None:
        col, row = pos_term
        s = s + col * row                                   # width-1 column: VPU
    vx, vy, vz = (mm(vh[c], w_v) for c in range(3))
    if act:
        # vector_act = sigmoid applied to the per-channel vector norm
        nrm = jnp.sqrt(jnp.maximum(vx * vx + vy * vy + vz * vz, 1e-8))
        gate = jax.nn.sigmoid(nrm)
        vx, vy, vz = vx * gate, vy * gate, vz * gate
        s = jnp.maximum(s, 0.0)                             # scalar_act = relu
    return s, vx, vy, vz


def _gvp_ln(s, vx, vy, vz, gamma, beta):
    """GVPLayerNorm on already-loaded VMEM values (all f32)."""
    mu = jnp.mean(s, axis=-1, keepdims=True)
    var = jnp.mean(jnp.square(s - mu), axis=-1, keepdims=True)
    s = (s - mu) * jax.lax.rsqrt(var + 1e-5) * gamma + beta
    sq = jnp.maximum(vx * vx + vy * vy + vz * vz, 1e-8)     # clamp per channel
    inv = jax.lax.rsqrt(jnp.mean(sq, axis=-1, keepdims=True))
    return s, vx * inv, vy * inv, vz * inv


# ----------------------------- fused per-layer kernel -----------------------------

def _mpnn_layer_kernel(
        state_ref, send_ref,
        # edge GVP + LN weights
        e_wlrh_rec_ref, e_wlrh_snd_ref, e_ws_rec_ref, e_ws_snd_ref, e_ws_pos_ref,
        e_wdots_ref, e_bs_ref, e_wv_ref, e_gamma_ref, e_beta_ref,
        # node GVP + LN weights
        n_wlrh_nod_ref, n_wlrh_agg_ref, n_ws_nod_ref, n_ws_agg_ref,
        n_wdots_ref, n_bs_ref, n_wv_ref, n_gamma_ref, n_beta_ref,
        out_ref, sagg_ref, vagg_ref,
        *, hs, hv, h, k, compute_dtype):
    """Grid (node_blocks, k).  Per step: one edge message for neighbor slot j,
    accumulated into scratch; on j == k-1 the node update + LN + residual."""
    j = pl.program_id(1)

    def mm(a, b):
        return jnp.dot(a.astype(compute_dtype), b.astype(compute_dtype),
                       preferred_element_type=jnp.float32)

    @pl.when(j == 0)
    def _():
        sagg_ref[...] = jnp.zeros_like(sagg_ref)
        vagg_ref[...] = jnp.zeros_like(vagg_ref)

    state = state_ref[...]                                   # (T, hs+3hv) receiver rows
    send = send_ref[...]                                     # (T, hs+3hv+1) sender rows (+pos_diff)
    s_rec = state[:, :hs]
    v_rec = tuple(state[:, hs + c * hv: hs + (c + 1) * hv] for c in range(3))
    s_snd = send[:, :hs]
    v_snd = tuple(send[:, hs + c * hv: hs + (c + 1) * hv] for c in range(3))
    pos = send[:, hs + 3 * hv: hs + 3 * hv + 1].astype(jnp.float32)

    # ---- edge model: GVPLinear + (relu, sigmoid-gate) + GVPLayerNorm ----
    msg_s, mx, my, mz = _gvp_core(
        mm,
        s_terms=[(s_rec, e_ws_rec_ref[...]), (s_snd, e_ws_snd_ref[...])],
        pos_term=(pos, e_ws_pos_ref[...]),
        v_terms=[(v_rec, e_wlrh_rec_ref[...]), (v_snd, e_wlrh_snd_ref[...])],
        w_dot_s=e_wdots_ref[...], b_s=e_bs_ref[...], w_v=e_wv_ref[...],
        h=h, act=True)
    msg_s, mx, my, mz = _gvp_ln(msg_s, mx, my, mz, e_gamma_ref[...], e_beta_ref[...])

    # ---- aggregation (sum over the k neighbors, fused segment_sum) ----
    sagg_ref[...] += msg_s
    vagg_ref[0] = vagg_ref[0] + mx
    vagg_ref[1] = vagg_ref[1] + my
    vagg_ref[2] = vagg_ref[2] + mz

    # ---- node update: runs once per node block, after all k messages ----
    @pl.when(j == k - 1)
    def _():
        inv_sqrt_k = 1.0 / (k ** 0.5)       # every node receives exactly k messages
        s_agg = sagg_ref[...] * inv_sqrt_k
        v_agg = tuple(vagg_ref[c] * inv_sqrt_k for c in range(3))
        up_s, ux, uy, uz = _gvp_core(
            mm,
            s_terms=[(s_rec, n_ws_nod_ref[...]), (s_agg, n_ws_agg_ref[...])],
            pos_term=None,
            v_terms=[(v_rec, n_wlrh_nod_ref[...]), (v_agg, n_wlrh_agg_ref[...])],
            w_dot_s=n_wdots_ref[...], b_s=n_bs_ref[...], w_v=n_wv_ref[...],
            h=h, act=True)
        up_s, ux, uy, uz = _gvp_ln(up_s, ux, uy, uz, n_gamma_ref[...], n_beta_ref[...])
        # residual: h + node_model(h), written as the packed state slab
        s_rec32 = s_rec.astype(jnp.float32)
        v_rec32 = tuple(p.astype(jnp.float32) for p in v_rec)
        out_ref[:, :hs] = (up_s + s_rec32).astype(out_ref.dtype)
        out_ref[:, hs:hs + hv] = (ux + v_rec32[0]).astype(out_ref.dtype)
        out_ref[:, hs + hv:hs + 2 * hv] = (uy + v_rec32[1]).astype(out_ref.dtype)
        out_ref[:, hs + 2 * hv:hs + 3 * hv] = (uz + v_rec32[2]).astype(out_ref.dtype)


# ----------------------------- kernel wrapper -----------------------------

def mpnn_layer(lp, state, send_idx, pos_diff, *, hs, hv, k):
    """One full GVPMPNN layer (messages + aggregation + update + LNs + residual).

    state:    (N, hs + 3*hv) packed node features.
    send_idx: (k, N) int32 sender (neighbor) indices for every receiver.
    pos_diff: (k, N) f32   positions[sender] - positions[receiver].
    """
    n, c = state.shape
    # TODO(synk): the sender-side gather still materializes (k, N, C+1) in HBM;
    # a scalar-prefetch / DMA-gather kernel would remove this last gather pass.
    send_slab = jnp.concatenate(
        [state[send_idx], pos_diff[..., None].astype(state.dtype)], axis=-1)

    tile = _pick_tile(n)
    nb = pl.cdiv(n, tile)
    pad = nb * tile - n
    if pad:
        state_p = jnp.pad(state, ((0, pad), (0, 0)))
        send_p = jnp.pad(send_slab, ((0, 0), (0, pad), (0, 0)))
    else:
        state_p, send_p = state, send_slab

    e, nd = lp['edge'], lp['node']
    eln, nln = lp['edge_ln'], lp['node_ln']
    weights = [e['wlrh'][0], e['wlrh'][1], e['ws'][0], e['ws'][1], e['ws'][2],
               e['w_dot_s'], e['b_s'], e['wv'], eln['gamma'], eln['beta'],
               nd['wlrh'][0], nd['wlrh'][1], nd['ws'][0], nd['ws'][1],
               nd['w_dot_s'], nd['b_s'], nd['wv'], nln['gamma'], nln['beta']]

    row_map = lambda i, j: (i, 0)
    send_map = lambda i, j: (j, i, 0)
    w_map = lambda i, j: (0, 0)
    in_specs = ([pl.BlockSpec((tile, c), row_map),
                 pl.BlockSpec((None, tile, c + 1), send_map)]
                + [pl.BlockSpec(w.shape, w_map) for w in weights])
    out_specs = pl.BlockSpec((tile, c), row_map)

    kernel = functools.partial(_mpnn_layer_kernel, hs=hs, hv=hv, h=2 * hv, k=k,
                               compute_dtype=_MM_DTYPE)
    out = pl.pallas_call(
        kernel,
        out_shape=jax.ShapeDtypeStruct((nb * tile, c), state.dtype),
        grid=(nb, k),
        in_specs=in_specs,
        out_specs=out_specs,
        scratch_shapes=[pltpu.VMEM((tile, hs), jnp.float32),
                        pltpu.VMEM((3, tile, hv), jnp.float32)],
        compiler_params=pltpu.CompilerParams(
            dimension_semantics=("parallel", "arbitrary"),
            vmem_limit_bytes=32 * 1024 * 1024),
    )(state_p, send_p, *weights)
    return out[:n]


# ----------------------------- plain-jnp projection GVP -----------------------------

def _gvp_linear_plain(p, s, v):
    """Reference GVPLinear (vi>0, vo>0, vector_gate=False, activations=(None,None)).
    Kept in XLA: with so = vo = 1 every Pallas store would be fully masked."""
    vl = jnp.einsum('cnd,dh->cnh', v, p['wl'])
    vr = jnp.einsum('cnd,dh->cnh', v, p['wr'])
    dot = jnp.sum(vl * vr, axis=0)                          # sum over the 3 coords
    vn = dot @ p['wo'] + p['bo']
    s_out = jnp.concatenate([s, vn], axis=-1) @ p['ws'] + p['bs']
    vh = jnp.einsum('cnd,dh->cnh', v, p['wh'])
    v_out = jnp.einsum('cnh,ho->cno', vh, p['wv'])
    return s_out, v_out


# ----------------------------- parameter init -----------------------------

def _linear_w(key, fan_in, fan_out):
    bound = 1.0 / (fan_in ** 0.5)
    return jax.random.uniform(key, (fan_in, fan_out), jnp.float32, -bound, bound)


def _linear_wb(key, fan_in, fan_out):
    kw, kb = jax.random.split(key)
    bound = 1.0 / (fan_in ** 0.5)
    w = jax.random.uniform(kw, (fan_in, fan_out), jnp.float32, -bound, bound)
    b = jax.random.uniform(kb, (1, fan_out), jnp.float32, -bound, bound)
    return w, b


def _split_rows(w, widths):
    parts, off = [], 0
    for wd in widths:
        parts.append(w[off:off + wd])
        off += wd
    return tuple(parts)


def init_gvp_linear(key, si, vi, so, vo):
    """Raw GVPLinear params (torch parameterization)."""
    h = max(vi, vo)
    k0, k1, k2, k3, k4, k5 = jax.random.split(key, 6)
    return dict(
        wl=_linear_w(k0, vi, h),             # dot_prod.linear_left  (no bias)
        wr=_linear_w(k1, vi, h),             # dot_prod.linear_right (no bias)
        wh=_linear_w(k3, vi, h),             # wh (no bias)
        wv=_linear_w(k5, h, vo),             # wv (no bias)
        **dict(zip(('wo', 'bo'), _linear_wb(k2, h, h))),       # dot_prod.linear_out
        **dict(zip(('ws', 'bs'), _linear_wb(k4, si + h, so))),  # ws on cat([s..., vn])
    )


def _pack_gvp(raw, s_widths, v_widths):
    """Kernel-packed weights: wl|wr|wh packed + row-split, ws row-split,
    wo/bo folded into the scalar path (W_dot_s = wo@ws_vn, b_s = bo@ws_vn + bs)."""
    h = raw['wo'].shape[0]
    si = raw['ws'].shape[0] - h
    ws_main, ws_vn = raw['ws'][:si], raw['ws'][si:]
    wlrh = jnp.concatenate([raw['wl'], raw['wr'], raw['wh']], axis=1)   # (vi, 3h)
    return dict(wlrh=_split_rows(wlrh, v_widths),
                ws=_split_rows(ws_main, s_widths),
                w_dot_s=raw['wo'] @ ws_vn,
                b_s=raw['bo'] @ ws_vn + raw['bs'],
                wv=raw['wv'])


def init_layernorm(hs):
    return dict(gamma=jnp.ones((1, hs), jnp.float32),
                beta=jnp.zeros((1, hs), jnp.float32))


def init_mpnn(key, hs, hv):
    ke, kn = jax.random.split(key)
    edge_raw = init_gvp_linear(ke, 2 * hs + 1, 2 * hv, hs, hv)
    node_raw = init_gvp_linear(kn, 2 * hs, 2 * hv, hs, hv)
    return dict(edge=_pack_gvp(edge_raw, (hs, hs, 1), (hv, hv)),
                edge_ln=init_layernorm(hs),
                node=_pack_gvp(node_raw, (hs, hs), (hv, hv)),
                node_ln=init_layernorm(hs))


def init_gvp(key, hs, hv, num_layers, num_tokens):
    keys = jax.random.split(key, num_layers + 3)
    # TODO(synk): CliffordAlgebra is constructed in __init__ but never used in forward; omitted.
    # TODO(synk): inv_feature_embedding is defined but unused in the forward path; omitted.
    return dict(
        aa_emb=jax.random.normal(keys[0], (num_tokens, hs), jnp.float32),
        feat_emb=jax.random.uniform(keys[1], (hv,), jnp.float32, -1.0, 1.0),  # Linear(1, hv, bias=False)
        layers=[init_mpnn(keys[2 + i], hs, hv) for i in range(num_layers)],
        proj=init_gvp_linear(keys[-1], hs, hv, 1, 1))


# ----------------------------- model (JAX glue) -----------------------------

def knn_neighbors(x, k, batch):
    # TODO(synk): torch_cluster.knn_graph replaced by brute-force dense kNN in plain JAX
    # (data-dependent neighbor selection; kept outside the Pallas hot path).
    # Assumes every protein has >= k atoms so each node receives exactly k messages
    # (matches bincount(edge_index[1]) with loop=True self-edges).
    n = x.shape[0]
    d2 = jnp.sum(jnp.square(x[:, None, :] - x[None, :, :]), axis=-1)
    same = batch[:, None] == batch[None, :]
    d2 = jnp.where(same, d2, jnp.inf)
    _, nbr = jax.lax.top_k(-d2, k)                    # (N, k); self is nearest (loop=True)
    return nbr


@functools.partial(jax.jit, static_argnames=('knn_k',))
def gvp_forward(params, coords_b, positions_b, seqs_b, masks, noise_key, knn_k):
    B, L = masks.shape
    # TODO(synk): boolean-mask compaction has no static-shape equivalent; masks assumed all-True.
    batch_idx = jnp.repeat(jnp.arange(B), 3 * L)
    coords = coords_b.reshape(-1, 3)                        # (N, 3), N = B*L*3 atoms
    positions = jnp.repeat(positions_b.reshape(-1), 3)
    seqs = jnp.repeat(seqs_b.reshape(-1), 3)
    noise = jax.random.normal(noise_key, coords.shape, jnp.float32)
    noised = coords + noise

    nbr = knn_neighbors(noised, knn_k, batch_idx)           # (N, k) sender indices
    send_idx = nbr.T                                        # (k, N)
    pos_diff = positions[send_idx] - positions[None, :]     # pos_i - pos_j (sender - receiver)

    # _featurization
    hs = params['aa_emb'].shape[1]
    hv = params['feat_emb'].shape[0]
    s = params['aa_emb'][seqs]                              # (N, hs)
    ones = jnp.ones((coords.shape[0],), jnp.float32)
    cnt = jax.ops.segment_sum(ones, batch_idx, num_segments=B)
    csum = jax.ops.segment_sum(noised, batch_idx, num_segments=B)
    coords_mean = (csum / cnt[:, None])[batch_idx]          # (N, 3)
    ci = noised - coords_mean
    f = params['feat_emb']
    vplanes = [ci[:, c:c + 1] * f[None, :] for c in range(3)]          # 3 x (N, hv)
    state = jnp.concatenate([s] + vplanes, axis=-1).astype(_ACT_DTYPE)  # (N, hs+3hv)

    for lp in params['layers']:
        state = mpnn_layer(lp, state, send_idx, pos_diff, hs=hs, hv=hv, k=knn_k)

    state = state.astype(jnp.float32)
    s_fin = state[:, :hs]
    v_fin = jnp.stack([state[:, hs + c * hv: hs + (c + 1) * hv] for c in range(3)], axis=0)
    s_out, v_out = _gvp_linear_plain(params['proj'], s_fin, v_fin)      # (N,1), (3,N,1)
    pred = jnp.squeeze(v_out, -1).T + coords_mean            # v.squeeze(1) + coords_mean
    loss = jnp.mean(jnp.square(pred - coords), axis=1)
    return jnp.mean(loss), {'loss': loss, 'feats': s_out}


# ----------------------------- main -----------------------------

if __name__ == "__main__":
    key = jax.random.PRNGKey(0)
    kp, kc, ks, kn = jax.random.split(key, 4)
    B, L = 2, 4                 # 2 proteins, 4 residues each -> N = 24 atom nodes
    hs, hv = 32, 8              # scalar / vector hidden channels (small)
    num_layers, knn_k, num_tokens = 2, 4, 20

    params = init_gvp(kp, hs, hv, num_layers, num_tokens)
    coords_b = jax.random.normal(kc, (B, L, 9), jnp.float32)   # 3 atoms x 3 coords / residue
    positions_b = jnp.tile(jnp.arange(L, dtype=jnp.float32)[None, :], (B, 1))
    seqs_b = jax.random.randint(ks, (B, L), 0, num_tokens)
    masks = jnp.ones((B, L), dtype=bool)

    loss, aux = gvp_forward(params, coords_b, positions_b, seqs_b, masks, kn, knn_k=knn_k)
    jax.block_until_ready(loss)
    print("KERNEL_OK")
</pallas_src>

<mosaic_0001>
module attributes {stable_mosaic.version = 11 : i64} {
  func.func @_mpnn_layer_kernel(%arg0: i32, %arg1: i32, %arg2: memref<8x56xf32, #tpu.memory_space<vmem>>, %arg3: memref<1x8x57xf32, #tpu.memory_space<vmem>>, %arg4: memref<8x48xf32, #tpu.memory_space<vmem>>, %arg5: memref<8x48xf32, #tpu.memory_space<vmem>>, %arg6: memref<32x32xf32, #tpu.memory_space<vmem>>, %arg7: memref<32x32xf32, #tpu.memory_space<vmem>>, %arg8: memref<1x32xf32, #tpu.memory_space<vmem>>, %arg9: memref<16x32xf32, #tpu.memory_space<vmem>>, %arg10: memref<1x32xf32, #tpu.memory_space<vmem>>, %arg11: memref<16x8xf32, #tpu.memory_space<vmem>>, %arg12: memref<1x32xf32, #tpu.memory_space<vmem>>, %arg13: memref<1x32xf32, #tpu.memory_space<vmem>>, %arg14: memref<8x48xf32, #tpu.memory_space<vmem>>, %arg15: memref<8x48xf32, #tpu.memory_space<vmem>>, %arg16: memref<32x32xf32, #tpu.memory_space<vmem>>, %arg17: memref<32x32xf32, #tpu.memory_space<vmem>>, %arg18: memref<16x32xf32, #tpu.memory_space<vmem>>, %arg19: memref<1x32xf32, #tpu.memory_space<vmem>>, %arg20: memref<16x8xf32, #tpu.memory_space<vmem>>, %arg21: memref<1x32xf32, #tpu.memory_space<vmem>>, %arg22: memref<1x32xf32, #tpu.memory_space<vmem>>, %arg23: memref<8x56xf32, #tpu.memory_space<vmem>>, %arg24: memref<8x32xf32, #tpu.memory_space<vmem>>, %arg25: memref<3x8x8xf32, #tpu.memory_space<vmem>>) attributes {dimension_semantics = [#tpu.dimension_semantics<parallel>, #tpu.dimension_semantics<arbitrary>], iteration_bounds = array<i64: 3, 4>, scalar_prefetch = 0 : i64, scratch_operands = 2 : i64, tpu.core_type = #tpu.core_type<tc>, window_params = [{transform_indices = @transform_0, window_bounds = array<i64: 8, 56>}, {transform_indices = @transform_1, window_bounds = array<i64: 1, 8, 57>}, {pipeline_mode = #tpu.pipeline_mode<synchronous>, transform_indices = @transform_2, window_bounds = array<i64: 8, 48>}, {pipeline_mode = #tpu.pipeline_mode<synchronous>, transform_indices = @transform_3, window_bounds = array<i64: 8, 48>}, {pipeline_mode = #tpu.pipeline_mode<synchronous>, transform_indices = @transform_4, window_bounds = array<i64: 32, 32>}, {pipeline_mode = #tpu.pipeline_mode<synchronous>, transform_indices = @transform_5, window_bounds = array<i64: 32, 32>}, {pipeline_mode = #tpu.pipeline_mode<synchronous>, transform_indices = @transform_6, window_bounds = array<i64: 1, 32>}, {pipeline_mode = #tpu.pipeline_mode<synchronous>, transform_indices = @transform_7, window_bounds = array<i64: 16, 32>}, {pipeline_mode = #tpu.pipeline_mode<synchronous>, transform_indices = @transform_8, window_bounds = array<i64: 1, 32>}, {pipeline_mode = #tpu.pipeline_mode<synchronous>, transform_indices = @transform_9, window_bounds = array<i64: 16, 8>}, {pipeline_mode = #tpu.pipeline_mode<synchronous>, transform_indices = @transform_10, window_bounds = array<i64: 1, 32>}, {pipeline_mode = #tpu.pipeline_mode<synchronous>, transform_indices = @transform_11, window_bounds = array<i64: 1, 32>}, {pipeline_mode = #tpu.pipeline_mode<synchronous>, transform_indices = @transform_12, window_bounds = array<i64: 8, 48>}, {pipeline_mode = #tpu.pipeline_mode<synchronous>, transform_indices = @transform_13, window_bounds = array<i64: 8, 48>}, {pipeline_mode = #tpu.pipeline_mode<synchronous>, transform_indices = @transform_14, window_bounds = array<i64: 32, 32>}, {pipeline_mode = #tpu.pipeline_mode<synchronous>, transform_indices = @transform_15, window_bounds = array<i64: 32, 32>}, {pipeline_mode = #tpu.pipeline_mode<synchronous>, transform_indices = @transform_16, window_bounds = array<i64: 16, 32>}, {pipeline_mode = #tpu.pipeline_mode<synchronous>, transform_indices = @transform_17, window_bounds = array<i64: 1, 32>}, {pipeline_mode = #tpu.pipeline_mode<synchronous>, transform_indices = @transform_18, window_bounds = array<i64: 16, 8>}, {pipeline_mode = #tpu.pipeline_mode<synchronous>, transform_indices = @transform_19, window_bounds = array<i64: 1, 32>}, {pipeline_mode = #tpu.pipeline_mode<synchronous>, transform_indices = @transform_20, window_bounds = array<i64: 1, 32>}, {transform_indices = @transform_21, window_bounds = array<i64: 8, 56>}]} {
    %c0_i32 = arith.constant 0 : i32
    %0 = arith.cmpi eq, %arg1, %c0_i32 : i32
    %1 = arith.extui %0 : i1 to i32
    %c0_i32_0 = arith.constant 0 : i32
    %2 = arith.cmpi ne, %1, %c0_i32_0 : i32
    scf.if %2 {
      %cst_68 = arith.constant 0.000000e+00 : f32
      %144 = vector.broadcast %cst_68 : f32 to vector<8x32xf32>
      %c0_69 = arith.constant 0 : index
      %c0_70 = arith.constant 0 : index
      %145 = vector.load %arg24[%c0_69, %c0_70] : memref<8x32xf32, #tpu.memory_space<vmem>>, vector<8x32xf32>
      tpu.vector_store %arg24[%c0_69, %c0_70], %144 {strides = array<i32>} : memref<8x32xf32, #tpu.memory_space<vmem>>, vector<8x32xf32>,
      %cst_71 = arith.constant 0.000000e+00 : f32
      %146 = vector.broadcast %cst_71 : f32 to vector<3x8x8xf32>
      %c0_72 = arith.constant 0 : index
      %c0_73 = arith.constant 0 : index
      %c0_74 = arith.constant 0 : index
      %147 = vector.load %arg25[%c0_72, %c0_73, %c0_74] : memref<3x8x8xf32, #tpu.memory_space<vmem>>, vector<3x8x8xf32>
      tpu.vector_store %arg25[%c0_72, %c0_73, %c0_74], %146 {strides = array<i32>} : memref<3x8x8xf32, #tpu.memory_space<vmem>>, vector<3x8x8xf32>,
    } else {
    }
    %c0 = arith.constant 0 : index
    %c0_1 = arith.constant 0 : index
    %3 = vector.load %arg2[%c0, %c0_1] : memref<8x56xf32, #tpu.memory_space<vmem>>, vector<8x56xf32>
    %c0_2 = arith.constant 0 : index
    %c0_3 = arith.constant 0 : index
    %c0_4 = arith.constant 0 : index
    %4 = vector.load %arg3[%c0_2, %c0_3, %c0_4] : memref<1x8x57xf32, #tpu.memory_space<vmem>>, vector<1x8x57xf32>
    %5 = vector.shape_cast %4 : vector<1x8x57xf32> to vector<8x57xf32>
    %6 = vector.extract_strided_slice %3 {offsets = [0, 0], sizes = [8, 32], strides = [1, 1]} : vector<8x56xf32> to vector<8x32xf32>
    %7 = vector.extract_strided_slice %3 {offsets = [0, 32], sizes = [8, 8], strides = [1, 1]} : vector<8x56xf32> to vector<8x8xf32>
    %8 = vector.extract_strided_slice %3 {offsets = [0, 40], sizes = [8, 8], strides = [1, 1]} : vector<8x56xf32> to vector<8x8xf32>
    %9 = vector.extract_strided_slice %3 {offsets = [0, 48], sizes = [8, 8], strides = [1, 1]} : vector<8x56xf32> to vector<8x8xf32>
    %10 = vector.extract_strided_slice %5 {offsets = [0, 0], sizes = [8, 32], strides = [1, 1]} : vector<8x57xf32> to vector<8x32xf32>
    %11 = vector.extract_strided_slice %5 {offsets = [0, 32], sizes = [8, 8], strides = [1, 1]} : vector<8x57xf32> to vector<8x8xf32>
    %12 = vector.extract_strided_slice %5 {offsets = [0, 40], sizes = [8, 8], strides = [1, 1]} : vector<8x57xf32> to vector<8x8xf32>
    %13 = vector.extract_strided_slice %5 {offsets = [0, 48], sizes = [8, 8], strides = [1, 1]} : vector<8x57xf32> to vector<8x8xf32>
    %14 = vector.extract_strided_slice %5 {offsets = [0, 56], sizes = [8, 1], strides = [1, 1]} : vector<8x57xf32> to vector<8x1xf32>
    %c0_5 = arith.constant 0 : index
    %c0_6 = arith.constant 0 : index
    %15 = vector.load %arg6[%c0_5, %c0_6] : memref<32x32xf32, #tpu.memory_space<vmem>>, vector<32x32xf32>
    %c0_7 = arith.constant 0 : index
    %c0_8 = arith.constant 0 : index
    %16 = vector.load %arg7[%c0_7, %c0_8] : memref<32x32xf32, #tpu.memory_space<vmem>>, vector<32x32xf32>
    %c0_9 = arith.constant 0 : index
    %c0_10 = arith.constant 0 : index
    %17 = vector.load %arg8[%c0_9, %c0_10] : memref<1x32xf32, #tpu.memory_space<vmem>>, vector<1x32xf32>
    %c0_11 = arith.constant 0 : index
    %c0_12 = arith.constant 0 : index
    %18 = vector.load %arg4[%c0_11, %c0_12] : memref<8x48xf32, #tpu.memory_space<vmem>>, vector<8x48xf32>
    %c0_13 = arith.constant 0 : index
    %c0_14 = arith.constant 0 : index
    %19 = vector.load %arg5[%c0_13, %c0_14] : memref<8x48xf32, #tpu.memory_space<vmem>>, vector<8x48xf32>
    %c0_15 = arith.constant 0 : index
    %c0_16 = arith.constant 0 : index
    %20 = vector.load %arg9[%c0_15, %c0_16] : memref<16x32xf32, #tpu.memory_space<vmem>>, vector<16x32xf32>
    %c0_17 = arith.constant 0 : index
    %c0_18 = arith.constant 0 : index
    %21 = vector.load %arg10[%c0_17, %c0_18] : memref<1x32xf32, #tpu.memory_space<vmem>>, vector<1x32xf32>
    %c0_19 = arith.constant 0 : index
    %c0_20 = arith.constant 0 : index
    %22 = vector.load %arg11[%c0_19, %c0_20] : memref<16x8xf32, #tpu.memory_space<vmem>>, vector<16x8xf32>
    %cst = arith.constant dense<0.000000e+00> : vector<8x48xf32>
    %23 = tpu.matmul %7, %18, %cst {dimension_numbers = #tpu.dot_dimension_numbers<[1], [0], [0], [1], [0, 0, 1, 1], [], []>} : vector<8x8xf32>, vector<8x48xf32>, vector<8x48xf32> -> vector<8x48xf32>
    %cst_21 = arith.constant dense<0.000000e+00> : vector<8x48xf32>
    %24 = tpu.matmul %8, %18, %cst_21 {dimension_numbers = #tpu.dot_dimension_numbers<[1], [0], [0], [1], [0, 0, 1, 1], [], []>} : vector<8x8xf32>, vector<8x48xf32>, vector<8x48xf32> -> vector<8x48xf32>
    %cst_22 = arith.constant dense<0.000000e+00> : vector<8x48xf32>
    %25 = tpu.matmul %9, %18, %cst_22 {dimension_numbers = #tpu.dot_dimension_numbers<[1], [0], [0], [1], [0, 0, 1, 1], [], []>} : vector<8x8xf32>, vector<8x48xf32>, vector<8x48xf32> -> vector<8x48xf32>
    %cst_23 = arith.constant dense<0.000000e+00> : vector<8x48xf32>
    %26 = tpu.matmul %11, %19, %cst_23 {dimension_numbers = #tpu.dot_dimension_numbers<[1], [0], [0], [1], [0, 0, 1, 1], [], []>} : vector<8x8xf32>, vector<8x48xf32>, vector<8x48xf32> -> vector<8x48xf32>
    %27 = arith.addf %23, %26 : vector<8x48xf32>
    %cst_24 = arith.constant dense<0.000000e+00> : vector<8x48xf32>
    %28 = tpu.matmul %12, %19, %cst_24 {dimension_numbers = #tpu.dot_dimension_numbers<[1], [0], [0], [1], [0, 0, 1, 1], [], []>} : vector<8x8xf32>, vector<8x48xf32>, vector<8x48xf32> -> vector<8x48xf32>
    %29 = arith.addf %24, %28 : vector<8x48xf32>
    %cst_25 = arith.constant dense<0.000000e+00> : vector<8x48xf32>
    %30 = tpu.matmul %13, %19, %cst_25 {dimension_numbers = #tpu.dot_dimension_numbers<[1], [0], [0], [1], [0, 0, 1, 1], [], []>} : vector<8x8xf32>, vector<8x48xf32>, vector<8x48xf32> -> vector<8x48xf32>
    %31 = arith.addf %25, %30 : vector<8x48xf32>
    %32 = vector.extract_strided_slice %27 {offsets = [0, 0], sizes = [8, 16], strides = [1, 1]} : vector<8x48xf32> to vector<8x16xf32>
    %33 = vector.extract_strided_slice %27 {offsets = [0, 16], sizes = [8, 16], strides = [1, 1]} : vector<8x48xf32> to vector<8x16xf32>
    %34 = vector.extract_strided_slice %27 {offsets = [0, 32], sizes = [8, 16], strides = [1, 1]} : vector<8x48xf32> to vector<8x16xf32>
    %35 = arith.mulf %32, %33 : vector<8x16xf32>
    %36 = vector.extract_strided_slice %29 {offsets = [0, 0], sizes = [8, 16], strides = [1, 1]} : vector<8x48xf32> to vector<8x16xf32>
    %37 = vector.extract_strided_slice %29 {offsets = [0, 16], sizes = [8, 16], strides = [1, 1]} : vector<8x48xf32> to vector<8x16xf32>
    %38 = vector.extract_strided_slice %29 {offsets = [0, 32], sizes = [8, 16], strides = [1, 1]} : vector<8x48xf32> to vector<8x16xf32>
    %39 = arith.mulf %36, %37 : vector<8x16xf32>
    %40 = arith.addf %35, %39 : vector<8x16xf32>
    %41 = vector.extract_strided_slice %31 {offsets = [0, 0], sizes = [8, 16], strides = [1, 1]} : vector<8x48xf32> to vector<8x16xf32>
    %42 = vector.extract_strided_slice %31 {offsets = [0, 16], sizes = [8, 16], strides = [1, 1]} : vector<8x48xf32> to vector<8x16xf32>
    %43 = vector.extract_strided_slice %31 {offsets = [0, 32], sizes = [8, 16], strides = [1, 1]} : vector<8x48xf32> to vector<8x16xf32>
    %44 = arith.mulf %41, %42 : vector<8x16xf32>
    %45 = arith.addf %40, %44 : vector<8x16xf32>
    %cst_26 = arith.constant dense<0.000000e+00> : vector<8x32xf32>
    %46 = tpu.matmul %45, %20, %cst_26 {dimension_numbers = #tpu.dot_dimension_numbers<[1], [0], [0], [1], [0, 0, 1, 1], [], []>} : vector<8x16xf32>, vector<16x32xf32>, vector<8x32xf32> -> vector<8x32xf32>
    %47 = vector.broadcast %21 : vector<1x32xf32> to vector<8x32xf32>
    %48 = arith.addf %46, %47 : vector<8x32xf32>
    %cst_27 = arith.constant dense<0.000000e+00> : vector<8x32xf32>
    %49 = tpu.matmul %6, %15, %cst_27 {dimension_numbers = #tpu.dot_dimension_numbers<[1], [0], [0], [1], [0, 0, 1, 1], [], []>} : vector<8x32xf32>, vector<32x32xf32>, vector<8x32xf32> -> vector<8x32xf32>
    %50 = arith.addf %48, %49 : vector<8x32xf32>
    %cst_28 = arith.constant dense<0.000000e+00> : vector<8x32xf32>
    %51 = tpu.matmul %10, %16, %cst_28 {dimension_numbers = #tpu.dot_dimension_numbers<[1], [0], [0], [1], [0, 0, 1, 1], [], []>} : vector<8x32xf32>, vector<32x32xf32>, vector<8x32xf32> -> vector<8x32xf32>
    %52 = arith.addf %50, %51 : vector<8x32xf32>
    %53 = vector.broadcast %14 : vector<8x1xf32> to vector<8x32xf32>
    %54 = vector.broadcast %17 : vector<1x32xf32> to vector<8x32xf32>
    %55 = arith.mulf %53, %54 : vector<8x32xf32>
    %56 = arith.addf %52, %55 : vector<8x32xf32>
    %cst_29 = arith.constant dense<0.000000e+00> : vector<8x8xf32>
    %57 = tpu.matmul %34, %22, %cst_29 {dimension_numbers = #tpu.dot_dimension_numbers<[1], [0], [0], [1], [0, 0, 1, 1], [], []>} : vector<8x16xf32>, vector<16x8xf32>, vector<8x8xf32> -> vector<8x8xf32>
    %cst_30 = arith.constant dense<0.000000e+00> : vector<8x8xf32>
    %58 = tpu.matmul %38, %22, %cst_30 {dimension_numbers = #tpu.dot_dimension_numbers<[1], [0], [0], [1], [0, 0, 1, 1], [], []>} : vector<8x16xf32>, vector<16x8xf32>, vector<8x8xf32> -> vector<8x8xf32>
    %cst_31 = arith.constant dense<0.000000e+00> : vector<8x8xf32>
    %59 = tpu.matmul %43, %22, %cst_31 {dimension_numbers = #tpu.dot_dimension_numbers<[1], [0], [0], [1], [0, 0, 1, 1], [], []>} : vector<8x16xf32>, vector<16x8xf32>, vector<8x8xf32> -> vector<8x8xf32>
    %60 = arith.mulf %57, %57 : vector<8x8xf32>
    %61 = arith.mulf %58, %58 : vector<8x8xf32>
    %62 = arith.addf %60, %61 : vector<8x8xf32>
    %63 = arith.mulf %59, %59 : vector<8x8xf32>
    %64 = arith.addf %62, %63 : vector<8x8xf32>
    %cst_32 = arith.constant 9.99999993E-9 : f32
    %65 = vector.broadcast %cst_32 : f32 to vector<8x8xf32>
    %66 = arith.maximumf %64, %65 : vector<8x8xf32>
    %67 = math.sqrt %66 : vector<8x8xf32>
    %68 = arith.negf %67 : vector<8x8xf32>
    %69 = math.exp %68 : vector<8x8xf32>
    %cst_33 = arith.constant 1.000000e+00 : f32
    %70 = vector.broadcast %cst_33 : f32 to vector<8x8xf32>
    %71 = arith.addf %70, %69 : vector<8x8xf32>
    %72 = arith.divf %70, %71 : vector<8x8xf32>
    %73 = arith.mulf %57, %72 : vector<8x8xf32>
    %74 = arith.mulf %58, %72 : vector<8x8xf32>
    %75 = arith.mulf %59, %72 : vector<8x8xf32>
    %cst_34 = arith.constant 0.000000e+00 : f32
    %76 = vector.broadcast %cst_34 : f32 to vector<8x32xf32>
    %77 = arith.maximumf %56, %76 : vector<8x32xf32>
    %c0_35 = arith.constant 0 : index
    %c0_36 = arith.constant 0 : index
    %78 = vector.load %arg12[%c0_35, %c0_36] : memref<1x32xf32, #tpu.memory_space<vmem>>, vector<1x32xf32>
    %c0_37 = arith.constant 0 : index
    %c0_38 = arith.constant 0 : index
    %79 = vector.load %arg13[%c0_37, %c0_38] : memref<1x32xf32, #tpu.memory_space<vmem>>, vector<1x32xf32>
    %cst_39 = arith.constant dense<0.000000e+00> : vector<8xf32>
    %80 = vector.multi_reduction <add>, %77, %cst_39 [1] : vector<8x32xf32> to vector<8xf32>
    %81 = vector.shape_cast %80 : vector<8xf32> to vector<8x1xf32>
    %cst_40 = arith.constant 3.200000e+01 : f32
    %82 = vector.broadcast %cst_40 : f32 to vector<8x1xf32>
    %83 = arith.divf %81, %82 : vector<8x1xf32>
    %84 = vector.broadcast %83 : vector<8x1xf32> to vector<8x32xf32>
    %85 = arith.subf %77, %84 : vector<8x32xf32>
    %86 = arith.mulf %85, %85 : vector<8x32xf32>
    %cst_41 = arith.constant dense<0.000000e+00> : vector<8xf32>
    %87 = vector.multi_reduction <add>, %86, %cst_41 [1] : vector<8x32xf32> to vector<8xf32>
    %88 = vector.shape_cast %87 : vector<8xf32> to vector<8x1xf32>
    %cst_42 = arith.constant 3.200000e+01 : f32
    %89 = vector.broadcast %cst_42 : f32 to vector<8x1xf32>
    %90 = arith.divf %88, %89 : vector<8x1xf32>
    %91 = vector.broadcast %83 : vector<8x1xf32> to vector<8x32xf32>
    %92 = arith.subf %77, %91 : vector<8x32xf32>
    %cst_43 = arith.constant 9.99999974E-6 : f32
    %93 = vector.broadcast %cst_43 : f32 to vector<8x1xf32>
    %94 = arith.addf %90, %93 : vector<8x1xf32>
    %95 = math.rsqrt %94 : vector<8x1xf32>
    %96 = vector.broadcast %95 : vector<8x1xf32> to vector<8x32xf32>
    %97 = arith.mulf %92, %96 : vector<8x32xf32>
    %98 = vector.broadcast %78 : vector<1x32xf32> to vector<8x32xf32>
    %99 = arith.mulf %97, %98 : vector<8x32xf32>
    %100 = vector.broadcast %79 : vector<1x32xf32> to vector<8x32xf32>
    %101 = arith.addf %99, %100 : vector<8x32xf32>
    %102 = arith.mulf %73, %73 : vector<8x8xf32>
    %103 = arith.mulf %74, %74 : vector<8x8xf32>
    %104 = arith.addf %102, %103 : vector<8x8xf32>
    %105 = arith.mulf %75, %75 : vector<8x8xf32>
    %106 = arith.addf %104, %105 : vector<8x8xf32>
    %cst_44 = arith.constant 9.99999993E-9 : f32
    %107 = vector.broadcast %cst_44 : f32 to vector<8x8xf32>
    %108 = arith.maximumf %106, %107 : vector<8x8xf32>
    %cst_45 = arith.constant dense<0.000000e+00> : vector<8xf32>
    %109 = vector.multi_reduction <add>, %108, %cst_45 [1] : vector<8x8xf32> to vector<8xf32>
    %110 = vector.shape_cast %109 : vector<8xf32> to vector<8x1xf32>
    %cst_46 = arith.constant 8.000000e+00 : f32
    %111 = vector.broadcast %cst_46 : f32 to vector<8x1xf32>
    %112 = arith.divf %110, %111 : vector<8x1xf32>
    %113 = math.rsqrt %112 : vector<8x1xf32>
    %114 = vector.broadcast %113 : vector<8x1xf32> to vector<8x8xf32>
    %115 = arith.mulf %73, %114 : vector<8x8xf32>
    %116 = vector.broadcast %113 : vector<8x1xf32> to vector<8x8xf32>
    %117 = arith.mulf %74, %116 : vector<8x8xf32>
    %118 = vector.broadcast %113 : vector<8x1xf32> to vector<8x8xf32>
    %119 = arith.mulf %75, %118 : vector<8x8xf32>
    %c0_47 = arith.constant 0 : index
    %c0_48 = arith.constant 0 : index
    %120 = vector.load %arg24[%c0_47, %c0_48] : memref<8x32xf32, #tpu.memory_space<vmem>>, vector<8x32xf32>
    %121 = arith.addf %120, %101 : vector<8x32xf32>
    %c0_49 = arith.constant 0 : index
    %c0_50 = arith.constant 0 : index
    %122 = vector.load %arg24[%c0_49, %c0_50] : memref<8x32xf32, #tpu.memory_space<vmem>>, vector<8x32xf32>
    tpu.vector_store %arg24[%c0_49, %c0_50], %121 {strides = array<i32>} : memref<8x32xf32, #tpu.memory_space<vmem>>, vector<8x32xf32>,
    %c0_51 = arith.constant 0 : index
    %c0_52 = arith.constant 0 : index
    %c0_53 = arith.constant 0 : index
    %123 = vector.load %arg25[%c0_51, %c0_52, %c0_53] : memref<3x8x8xf32, #tpu.memory_space<vmem>>, vector<1x8x8xf32>
    %124 = vector.shape_cast %123 : vector<1x8x8xf32> to vector<8x8xf32>
    %125 = arith.addf %124, %115 : vector<8x8xf32>
    %c0_54 = arith.constant 0 : index
    %c0_55 = arith.constant 0 : index
    %c0_56 = arith.constant 0 : index
    %126 = vector.load %arg25[%c0_54, %c0_55, %c0_56] : memref<3x8x8xf32, #tpu.memory_space<vmem>>, vector<1x8x8xf32>
    %127 = vector.shape_cast %126 : vector<1x8x8xf32> to vector<8x8xf32>
    %128 = vector.shape_cast %125 : vector<8x8xf32> to vector<1x8x8xf32>
    tpu.vector_store %arg25[%c0_54, %c0_55, %c0_56], %128 {strides = array<i32>} : memref<3x8x8xf32, #tpu.memory_space<vmem>>, vector<1x8x8xf32>,
    %c1 = arith.constant 1 : index
    %c0_57 = arith.constant 0 : index
    %c0_58 = arith.constant 0 : index
    %129 = vector.load %arg25[%c1, %c0_57, %c0_58] : memref<3x8x8xf32, #tpu.memory_space<vmem>>, vector<1x8x8xf32>
    %130 = vector.shape_cast %129 : vector<1x8x8xf32> to vector<8x8xf32>
    %131 = arith.addf %130, %117 : vector<8x8xf32>
    %c1_59 = arith.constant 1 : index
    %c0_60 = arith.constant 0 : index
    %c0_61 = arith.constant 0 : index
    %132 = vector.load %arg25[%c1_59, %c0_60, %c0_61] : memref<3x8x8xf32, #tpu.memory_space<vmem>>, vector<1x8x8xf32>
    %133 = vector.shape_cast %132 : vector<1x8x8xf32> to vector<8x8xf32>
    %134 = vector.shape_cast %131 : vector<8x8xf32> to vector<1x8x8xf32>
    tpu.vector_store %arg25[%c1_59, %c0_60, %c0_61], %134 {strides = array<i32>} : memref<3x8x8xf32, #tpu.memory_space<vmem>>, vector<1x8x8xf32>,
    %c2 = arith.constant 2 : index
    %c0_62 = arith.constant 0 : index
    %c0_63 = arith.constant 0 : index
    %135 = vector.load %arg25[%c2, %c0_62, %c0_63] : memref<3x8x8xf32, #tpu.memory_space<vmem>>, vector<1x8x8xf32>
    %136 = vector.shape_cast %135 : vector<1x8x8xf32> to vector<8x8xf32>
    %137 = arith.addf %136, %119 : vector<8x8xf32>
    %c2_64 = arith.constant 2 : index
    %c0_65 = arith.constant 0 : index
    %c0_66 = arith.constant 0 : index
    %138 = vector.load %arg25[%c2_64, %c0_65, %c0_66] : memref<3x8x8xf32, #tpu.memory_space<vmem>>, vector<1x8x8xf32>
    %139 = vector.shape_cast %138 : vector<1x8x8xf32> to vector<8x8xf32>
    %140 = vector.shape_cast %137 : vector<8x8xf32> to vector<1x8x8xf32>
    tpu.vector_store %arg25[%c2_64, %c0_65, %c0_66], %140 {strides = array<i32>} : memref<3x8x8xf32, #tpu.memory_space<vmem>>, vector<1x8x8xf32>,
    %c3_i32 = arith.constant 3 : i32
    %141 = arith.cmpi eq, %arg1, %c3_i32 : i32
    %142 = arith.extui %141 : i1 to i32
    %c0_i32_67 = arith.constant 0 : i32
    %143 = arith.cmpi ne, %142, %c0_i32_67 : i32
    scf.if %143 {
      %c0_68 = arith.constant 0 : index
      %c0_69 = arith.constant 0 : index
      %144 = vector.load %arg24[%c0_68, %c0_69] : memref<8x32xf32, #tpu.memory_space<vmem>>, vector<8x32xf32>
      %cst_70 = arith.constant 5.000000e-01 : f32
      %145 = vector.broadcast %cst_70 : f32 to vector<8x32xf32>
      %146 = arith.mulf %144, %145 : vector<8x32xf32>
      %c0_71 = arith.constant 0 : index
      %c0_72 = arith.constant 0 : index
      %c0_73 = arith.constant 0 : index
      %147 = vector.load %arg25[%c0_71, %c0_72, %c0_73] : memref<3x8x8xf32, #tpu.memory_space<vmem>>, vector<1x8x8xf32>
      %148 = vector.shape_cast %147 : vector<1x8x8xf32> to vector<8x8xf32>
      %cst_74 = arith.constant 5.000000e-01 : f32
      %149 = vector.broadcast %cst_74 : f32 to vector<8x8xf32>
      %150 = arith.mulf %148, %149 : vector<8x8xf32>
      %c1_75 = arith.constant 1 : index
      %c0_76 = arith.constant 0 : index
      %c0_77 = arith.constant 0 : index
      %151 = vector.load %arg25[%c1_75, %c0_76, %c0_77] : memref<3x8x8xf32, #tpu.memory_space<vmem>>, vector<1x8x8xf32>
      %152 = vector.shape_cast %151 : vector<1x8x8xf32> to vector<8x8xf32>
      %cst_78 = arith.constant 5.000000e-01 : f32
      %153 = vector.broadcast %cst_78 : f32 to vector<8x8xf32>
      %154 = arith.mulf %152, %153 : vector<8x8xf32>
      %c2_79 = arith.constant 2 : index
      %c0_80 = arith.constant 0 : index
      %c0_81 = arith.constant 0 : index
      %155 = vector.load %arg25[%c2_79, %c0_80, %c0_81] : memref<3x8x8xf32, #tpu.memory_space<vmem>>, vector<1x8x8xf32>
      %156 = vector.shape_cast %155 : vector<1x8x8xf32> to vector<8x8xf32>
      %cst_82 = arith.constant 5.000000e-01 : f32
      %157 = vector.broadcast %cst_82 : f32 to vector<8x8xf32>
      %158 = arith.mulf %156, %157 : vector<8x8xf32>
      %c0_83 = arith.constant 0 : index
      %c0_84 = arith.constant 0 : index
      %159 = vector.load %arg16[%c0_83, %c0_84] : memref<32x32xf32, #tpu.memory_space<vmem>>, vector<32x32xf32>
      %c0_85 = arith.constant 0 : index
      %c0_86 = arith.constant 0 : index
      %160 = vector.load %arg17[%c0_85, %c0_86] : memref<32x32xf32, #tpu.memory_space<vmem>>, vector<32x32xf32>
      %c0_87 = arith.constant 0 : index
      %c0_88 = arith.constant 0 : index
      %161 = vector.load %arg14[%c0_87, %c0_88] : memref<8x48xf32, #tpu.memory_space<vmem>>, vector<8x48xf32>
      %c0_89 = arith.constant 0 : index
      %c0_90 = arith.constant 0 : index
      %162 = vector.load %arg15[%c0_89, %c0_90] : memref<8x48xf32, #tpu.memory_space<vmem>>, vector<8x48xf32>
      %c0_91 = arith.constant 0 : index
      %c0_92 = arith.constant 0 : index
      %163 = vector.load %arg18[%c0_91, %c0_92] : memref<16x32xf32, #tpu.memory_space<vmem>>, vector<16x32xf32>
      %c0_93 = arith.constant 0 : index
      %c0_94 = arith.constant 0 : index
      %164 = vector.load %arg19[%c0_93, %c0_94] : memref<1x32xf32, #tpu.memory_space<vmem>>, vector<1x32xf32>
      %c0_95 = arith.constant 0 : index
      %c0_96 = arith.constant 0 : index
      %165 = vector.load %arg20[%c0_95, %c0_96] : memref<16x8xf32, #tpu.memory_space<vmem>>, vector<16x8xf32>
      %cst_97 = arith.constant dense<0.000000e+00> : vector<8x48xf32>
      %166 = tpu.matmul %7, %161, %cst_97 {dimension_numbers = #tpu.dot_dimension_numbers<[1], [0], [0], [1], [0, 0, 1, 1], [], []>} : vector<8x8xf32>, vector<8x48xf32>, vector<8x48xf32> -> vector<8x48xf32>
      %cst_98 = arith.constant dense<0.000000e+00> : vector<8x48xf32>
      %167 = tpu.matmul %8, %161, %cst_98 {dimension_numbers = #tpu.dot_dimension_numbers<[1], [0], [0], [1], [0, 0, 1, 1], [], []>} : vector<8x8xf32>, vector<8x48xf32>, vector<8x48xf32> -> vector<8x48xf32>
      %cst_99 = arith.constant dense<0.000000e+00> : vector<8x48xf32>
      %168 = tpu.matmul %9, %161, %cst_99 {dimension_numbers = #tpu.dot_dimension_numbers<[1], [0], [0], [1], [0, 0, 1, 1], [], []>} : vector<8x8xf32>, vector<8x48xf32>, vector<8x48xf32> -> vector<8x48xf32>
      %cst_100 = arith.constant dense<0.000000e+00> : vector<8x48xf32>
      %169 = tpu.matmul %150, %162, %cst_100 {dimension_numbers = #tpu.dot_dimension_numbers<[1], [0], [0], [1], [0, 0, 1, 1], [], []>} : vector<8x8xf32>, vector<8x48xf32>, vector<8x48xf32> -> vector<8x48xf32>
      %170 = arith.addf %166, %169 : vector<8x48xf32>
      %cst_101 = arith.constant dense<0.000000e+00> : vector<8x48xf32>
      %171 = tpu.matmul %154, %162, %cst_101 {dimension_numbers = #tpu.dot_dimension_numbers<[1], [0], [0], [1], [0, 0, 1, 1], [], []>} : vector<8x8xf32>, vector<8x48xf32>, vector<8x48xf32> -> vector<8x48xf32>
      %172 = arith.addf %167, %171 : vector<8x48xf32>
      %cst_102 = arith.constant dense<0.000000e+00> : vector<8x48xf32>
      %173 = tpu.matmul %158, %162, %cst_102 {dimension_numbers = #tpu.dot_dimension_numbers<[1], [0], [0], [1], [0, 0, 1, 1], [], []>} : vector<8x8xf32>, vector<8x48xf32>, vector<8x48xf32> -> vector<8x48xf32>
      %174 = arith.addf %168, %173 : vector<8x48xf32>
      %175 = vector.extract_strided_slice %170 {offsets = [0, 0], sizes = [8, 16], strides = [1, 1]} : vector<8x48xf32> to vector<8x16xf32>
      %176 = vector.extract_strided_slice %170 {offsets = [0, 16], sizes = [8, 16], strides = [1, 1]} : vector<8x48xf32> to vector<8x16xf32>
      %177 = vector.extract_strided_slice %170 {offsets = [0, 32], sizes = [8, 16], strides = [1, 1]} : vector<8x48xf32> to vector<8x16xf32>
      %178 = arith.mulf %175, %176 : vector<8x16xf32>
      %179 = vector.extract_strided_slice %172 {offsets = [0, 0], sizes = [8, 16], strides = [1, 1]} : vector<8x48xf32> to vector<8x16xf32>
      %180 = vector.extract_strided_slice %172 {offsets = [0, 16], sizes = [8, 16], strides = [1, 1]} : vector<8x48xf32> to vector<8x16xf32>
      %181 = vector.extract_strided_slice %172 {offsets = [0, 32], sizes = [8, 16], strides = [1, 1]} : vector<8x48xf32> to vector<8x16xf32>
      %182 = arith.mulf %179, %180 : vector<8x16xf32>
      %183 = arith.addf %178, %182 : vector<8x16xf32>
      %184 = vector.extract_strided_slice %174 {offsets = [0, 0], sizes = [8, 16], strides = [1, 1]} : vector<8x48xf32> to vector<8x16xf32>
      %185 = vector.extract_strided_slice %174 {offsets = [0, 16], sizes = [8, 16], strides = [1, 1]} : vector<8x48xf32> to vector<8x16xf32>
      %186 = vector.extract_strided_slice %174 {offsets = [0, 32], sizes = [8, 16], strides = [1, 1]} : vector<8x48xf32> to vector<8x16xf32>
      %187 = arith.mulf %184, %185 : vector<8x16xf32>
      %188 = arith.addf %183, %187 : vector<8x16xf32>
      %cst_103 = arith.constant dense<0.000000e+00> : vector<8x32xf32>
      %189 = tpu.matmul %188, %163, %cst_103 {dimension_numbers = #tpu.dot_dimension_numbers<[1], [0], [0], [1], [0, 0, 1, 1], [], []>} : vector<8x16xf32>, vector<16x32xf32>, vector<8x32xf32> -> vector<8x32xf32>
      %190 = vector.broadcast %164 : vector<1x32xf32> to vector<8x32xf32>
      %191 = arith.addf %189, %190 : vector<8x32xf32>
      %cst_104 = arith.constant dense<0.000000e+00> : vector<8x32xf32>
      %192 = tpu.matmul %6, %159, %cst_104 {dimension_numbers = #tpu.dot_dimension_numbers<[1], [0], [0], [1], [0, 0, 1, 1], [], []>} : vector<8x32xf32>, vector<32x32xf32>, vector<8x32xf32> -> vector<8x32xf32>
      %193 = arith.addf %191, %192 : vector<8x32xf32>
      %cst_105 = arith.constant dense<0.000000e+00> : vector<8x32xf32>
      %194 = tpu.matmul %146, %160, %cst_105 {dimension_numbers = #tpu.dot_dimension_numbers<[1], [0], [0], [1], [0, 0, 1, 1], [], []>} : vector<8x32xf32>, vector<32x32xf32>, vector<8x32xf32> -> vector<8x32xf32>
      %195 = arith.addf %193, %194 : vector<8x32xf32>
      %cst_106 = arith.constant dense<0.000000e+00> : vector<8x8xf32>
      %196 = tpu.matmul %177, %165, %cst_106 {dimension_numbers = #tpu.dot_dimension_numbers<[1], [0], [0], [1], [0, 0, 1, 1], [], []>} : vector<8x16xf32>, vector<16x8xf32>, vector<8x8xf32> -> vector<8x8xf32>
      %cst_107 = arith.constant dense<0.000000e+00> : vector<8x8xf32>
      %197 = tpu.matmul %181, %165, %cst_107 {dimension_numbers = #tpu.dot_dimension_numbers<[1], [0], [0], [1], [0, 0, 1, 1], [], []>} : vector<8x16xf32>, vector<16x8xf32>, vector<8x8xf32> -> vector<8x8xf32>
      %cst_108 = arith.constant dense<0.000000e+00> : vector<8x8xf32>
      %198 = tpu.matmul %186, %165, %cst_108 {dimension_numbers = #tpu.dot_dimension_numbers<[1], [0], [0], [1], [0, 0, 1, 1], [], []>} : vector<8x16xf32>, vector<16x8xf32>, vector<8x8xf32> -> vector<8x8xf32>
      %199 = arith.mulf %196, %196 : vector<8x8xf32>
      %200 = arith.mulf %197, %197 : vector<8x8xf32>
      %201 = arith.addf %199, %200 : vector<8x8xf32>
      %202 = arith.mulf %198, %198 : vector<8x8xf32>
      %203 = arith.addf %201, %202 : vector<8x8xf32>
      %cst_109 = arith.constant 9.99999993E-9 : f32
      %204 = vector.broadcast %cst_109 : f32 to vector<8x8xf32>
      %205 = arith.maximumf %203, %204 : vector<8x8xf32>
      %206 = math.sqrt %205 : vector<8x8xf32>
      %207 = arith.negf %206 : vector<8x8xf32>
      %208 = math.exp %207 : vector<8x8xf32>
      %cst_110 = arith.constant 1.000000e+00 : f32
      %209 = vector.broadcast %cst_110 : f32 to vector<8x8xf32>
      %210 = arith.addf %209, %208 : vector<8x8xf32>
      %211 = arith.divf %209, %210 : vector<8x8xf32>
      %212 = arith.mulf %196, %211 : vector<8x8xf32>
      %213 = arith.mulf %197, %211 : vector<8x8xf32>
      %214 = arith.mulf %198, %211 : vector<8x8xf32>
      %cst_111 = arith.constant 0.000000e+00 : f32
      %215 = vector.broadcast %cst_111 : f32 to vector<8x32xf32>
      %216 = arith.maximumf %195, %215 : vector<8x32xf32>
      %c0_112 = arith.constant 0 : index
      %c0_113 = arith.constant 0 : index
      %217 = vector.load %arg21[%c0_112, %c0_113] : memref<1x32xf32, #tpu.memory_space<vmem>>, vector<1x32xf32>
      %c0_114 = arith.constant 0 : index
      %c0_115 = arith.constant 0 : index
      %218 = vector.load %arg22[%c0_114, %c0_115] : memref<1x32xf32, #tpu.memory_space<vmem>>, vector<1x32xf32>
      %cst_116 = arith.constant dense<0.000000e+00> : vector<8xf32>
      %219 = vector.multi_reduction <add>, %216, %cst_116 [1] : vector<8x32xf32> to vector<8xf32>
      %220 = vector.shape_cast %219 : vector<8xf32> to vector<8x1xf32>
      %cst_117 = arith.constant 3.200000e+01 : f32
      %221 = vector.broadcast %cst_117 : f32 to vector<8x1xf32>
      %222 = arith.divf %220, %221 : vector<8x1xf32>
      %223 = vector.broadcast %222 : vector<8x1xf32> to vector<8x32xf32>
      %224 = arith.subf %216, %223 : vector<8x32xf32>
      %225 = arith.mulf %224, %224 : vector<8x32xf32>
      %cst_118 = arith.constant dense<0.000000e+00> : vector<8xf32>
      %226 = vector.multi_reduction <add>, %225, %cst_118 [1] : vector<8x32xf32> to vector<8xf32>
      %227 = vector.shape_cast %226 : vector<8xf32> to vector<8x1xf32>
      %cst_119 = arith.constant 3.200000e+01 : f32
      %228 = vector.broadcast %cst_119 : f32 to vector<8x1xf32>
      %229 = arith.divf %227, %228 : vector<8x1xf32>
      %230 = vector.broadcast %222 : vector<8x1xf32> to vector<8x32xf32>
      %231 = arith.subf %216, %230 : vector<8x32xf32>
      %cst_120 = arith.constant 9.99999974E-6 : f32
      %232 = vector.broadcast %cst_120 : f32 to vector<8x1xf32>
      %233 = arith.addf %229, %232 : vector<8x1xf32>
      %234 = math.rsqrt %233 : vector<8x1xf32>
      %235 = vector.broadcast %234 : vector<8x1xf32> to vector<8x32xf32>
      %236 = arith.mulf %231, %235 : vector<8x32xf32>
      %237 = vector.broadcast %217 : vector<1x32xf32> to vector<8x32xf32>
      %238 = arith.mulf %236, %237 : vector<8x32xf32>
      %239 = vector.broadcast %218 : vector<1x32xf32> to vector<8x32xf32>
      %240 = arith.addf %238, %239 : vector<8x32xf32>
      %241 = arith.mulf %212, %212 : vector<8x8xf32>
      %242 = arith.mulf %213, %213 : vector<8x8xf32>
      %243 = arith.addf %241, %242 : vector<8x8xf32>
      %244 = arith.mulf %214, %214 : vector<8x8xf32>
      %245 = arith.addf %243, %244 : vector<8x8xf32>
      %cst_121 = arith.constant 9.99999993E-9 : f32
      %246 = vector.broadcast %cst_121 : f32 to vector<8x8xf32>
      %247 = arith.maximumf %245, %246 : vector<8x8xf32>
      %cst_122 = arith.constant dense<0.000000e+00> : vector<8xf32>
      %248 = vector.multi_reduction <add>, %247, %cst_122 [1] : vector<8x8xf32> to vector<8xf32>
      %249 = vector.shape_cast %248 : vector<8xf32> to vector<8x1xf32>
      %cst_123 = arith.constant 8.000000e+00 : f32
      %250 = vector.broadcast %cst_123 : f32 to vector<8x1xf32>
      %251 = arith.divf %249, %250 : vector<8x1xf32>
      %252 = math.rsqrt %251 : vector<8x1xf32>
      %253 = vector.broadcast %252 : vector<8x1xf32> to vector<8x8xf32>
      %254 = arith.mulf %212, %253 : vector<8x8xf32>
      %255 = vector.broadcast %252 : vector<8x1xf32> to vector<8x8xf32>
      %256 = arith.mulf %213, %255 : vector<8x8xf32>
      %257 = vector.broadcast %252 : vector<8x1xf32> to vector<8x8xf32>
      %258 = arith.mulf %214, %257 : vector<8x8xf32>
      %259 = arith.addf %240, %6 : vector<8x32xf32>
      %c0_124 = arith.constant 0 : index
      %c0_125 = arith.constant 0 : index
      %260 = vector.load %arg23[%c0_124, %c0_125] : memref<8x56xf32, #tpu.memory_space<vmem>>, vector<8x32xf32>
      tpu.vector_store %arg23[%c0_124, %c0_125], %259 {strides = array<i32>} : memref<8x56xf32, #tpu.memory_space<vmem>>, vector<8x32xf32>,
      %261 = arith.addf %254, %7 : vector<8x8xf32>
      %c0_126 = arith.constant 0 : index
      %c32 = arith.constant 32 : index
      %262 = vector.load %arg23[%c0_126, %c32] : memref<8x56xf32, #tpu.memory_space<vmem>>, vector<8x8xf32>
      tpu.vector_store %arg23[%c0_126, %c32], %261 {strides = array<i32>} : memref<8x56xf32, #tpu.memory_space<vmem>>, vector<8x8xf32>,
      %263 = arith.addf %256, %8 : vector<8x8xf32>
      %c0_127 = arith.constant 0 : index
      %c40 = arith.constant 40 : index
      %264 = vector.load %arg23[%c0_127, %c40] : memref<8x56xf32, #tpu.memory_space<vmem>>, vector<8x8xf32>
      tpu.vector_store %arg23[%c0_127, %c40], %263 {strides = array<i32>} : memref<8x56xf32, #tpu.memory_space<vmem>>, vector<8x8xf32>,
      %265 = arith.addf %258, %9 : vector<8x8xf32>
      %c0_128 = arith.constant 0 : index
      %c48 = arith.constant 48 : index
      %266 = vector.load %arg23[%c0_128, %c48] : memref<8x56xf32, #tpu.memory_space<vmem>>, vector<8x8xf32>
      tpu.vector_store %arg23[%c0_128, %c48], %265 {strides = array<i32>} : memref<8x56xf32, #tpu.memory_space<vmem>>, vector<8x8xf32>,
    } else {
    }
    return
  }
  func.func @transform_0(%arg0: i32, %arg1: i32) -> (i32, i32) {
    %c0_i32 = arith.constant 0 : i32
    %c0_i32_0 = arith.constant 0 : i32
    return %arg0, %c0_i32 : i32, i32
  }
  func.func @transform_1(%arg0: i32, %arg1: i32) -> (i32, i32, i32) {
    %c0_i32 = arith.constant 0 : i32
    %c0_i32_0 = arith.constant 0 : i32
    return %arg1, %arg0, %c0_i32 : i32, i32, i32
  }
  func.func @transform_2(%arg0: i32, %arg1: i32) -> (i32, i32) {
    %c0_i32 = arith.constant 0 : i32
    %c0_i32_0 = arith.constant 0 : i32
    %c0_i32_1 = arith.constant 0 : i32
    return %c0_i32, %c0_i32_0 : i32, i32
  }
  func.func @transform_3(%arg0: i32, %arg1: i32) -> (i32, i32) {
    %c0_i32 = arith.constant 0 : i32
    %c0_i32_0 = arith.constant 0 : i32
    %c0_i32_1 = arith.constant 0 : i32
    return %c0_i32, %c0_i32_0 : i32, i32
  }
  func.func @transform_4(%arg0: i32, %arg1: i32) -> (i32, i32) {
    %c0_i32 = arith.constant 0 : i32
    %c0_i32_0 = arith.constant 0 : i32
    %c0_i32_1 = arith.constant 0 : i32
    return %c0_i32, %c0_i32_0 : i32, i32
  }
  func.func @transform_5(%arg0: i32, %arg1: i32) -> (i32, i32) {
    %c0_i32 = arith.constant 0 : i32
    %c0_i32_0 = arith.constant 0 : i32
    %c0_i32_1 = arith.constant 0 : i32
    return %c0_i32, %c0_i32_0 : i32, i32
  }
  func.func @transform_6(%arg0: i32, %arg1: i32) -> (i32, i32) {
    %c0_i32 = arith.constant 0 : i32
    %c0_i32_0 = arith.constant 0 : i32
    %c0_i32_1 = arith.constant 0 : i32
    return %c0_i32, %c0_i32_0 : i32, i32
  }
  func.func @transform_7(%arg0: i32, %arg1: i32) -> (i32, i32) {
    %c0_i32 = arith.constant 0 : i32
    %c0_i32_0 = arith.constant 0 : i32
    %c0_i32_1 = arith.constant 0 : i32
    return %c0_i32, %c0_i32_0 : i32, i32
  }
  func.func @transform_8(%arg0: i32, %arg1: i32) -> (i32, i32) {
    %c0_i32 = arith.constant 0 : i32
    %c0_i32_0 = arith.constant 0 : i32
    %c0_i32_1 = arith.constant 0 : i32
    return %c0_i32, %c0_i32_0 : i32, i32
  }
  func.func @transform_9(%arg0: i32, %arg1: i32) -> (i32, i32) {
    %c0_i32 = arith.constant 0 : i32
    %c0_i32_0 = arith.constant 0 : i32
    %c0_i32_1 = arith.constant 0 : i32
    return %c0_i32, %c0_i32_0 : i32, i32
  }
  func.func @transform_10(%arg0: i32, %arg1: i32) -> (i32, i32) {
    %c0_i32 = arith.constant 0 : i32
    %c0_i32_0 = arith.constant 0 : i32
    %c0_i32_1 = arith.constant 0 : i32
    return %c0_i32, %c0_i32_0 : i32, i32
  }
  func.func @transform_11(%arg0: i32, %arg1: i32) -> (i32, i32) {
    %c0_i32 = arith.constant 0 : i32
    %c0_i32_0 = arith.constant 0 : i32
    %c0_i32_1 = arith.constant 0 : i32
    return %c0_i32, %c0_i32_0 : i32, i32
  }
  func.func @transform_12(%arg0: i32, %arg1: i32) -> (i32, i32) {
    %c0_i32 = arith.constant 0 : i32
    %c0_i32_0 = arith.constant 0 : i32
    %c0_i32_1 = arith.constant 0 : i32
    return %c0_i32, %c0_i32_0 : i32, i32
  }
  func.func @transform_13(%arg0: i32, %arg1: i32) -> (i32, i32) {
    %c0_i32 = arith.constant 0 : i32
    %c0_i32_0 = arith.constant 0 : i32
    %c0_i32_1 = arith.constant 0 : i32
    return %c0_i32, %c0_i32_0 : i32, i32
  }
  func.func @transform_14(%arg0: i32, %arg1: i32) -> (i32, i32) {
    %c0_i32 = arith.constant 0 : i32
    %c0_i32_0 = arith.constant 0 : i32
    %c0_i32_1 = arith.constant 0 : i32
    return %c0_i32, %c0_i32_0 : i32, i32
  }
  func.func @transform_15(%arg0: i32, %arg1: i32) -> (i32, i32) {
    %c0_i32 = arith.constant 0 : i32
    %c0_i32_0 = arith.constant 0 : i32
    %c0_i32_1 = arith.constant 0 : i32
    return %c0_i32, %c0_i32_0 : i32, i32
  }
  func.func @transform_16(%arg0: i32, %arg1: i32) -> (i32, i32) {
    %c0_i32 = arith.constant 0 : i32
    %c0_i32_0 = arith.constant 0 : i32
    %c0_i32_1 = arith.constant 0 : i32
    return %c0_i32, %c0_i32_0 : i32, i32
  }
  func.func @transform_17(%arg0: i32, %arg1: i32) -> (i32, i32) {
    %c0_i32 = arith.constant 0 : i32
    %c0_i32_0 = arith.constant 0 : i32
    %c0_i32_1 = arith.constant 0 : i32
    return %c0_i32, %c0_i32_0 : i32, i32
  }
  func.func @transform_18(%arg0: i32, %arg1: i32) -> (i32, i32) {
    %c0_i32 = arith.constant 0 : i32
    %c0_i32_0 = arith.constant 0 : i32
    %c0_i32_1 = arith.constant 0 : i32
    return %c0_i32, %c0_i32_0 : i32, i32
  }
  func.func @transform_19(%arg0: i32, %arg1: i32) -> (i32, i32) {
    %c0_i32 = arith.constant 0 : i32
    %c0_i32_0 = arith.constant 0 : i32
    %c0_i32_1 = arith.constant 0 : i32
    return %c0_i32, %c0_i32_0 : i32, i32
  }
  func.func @transform_20(%arg0: i32, %arg1: i32) -> (i32, i32) {
    %c0_i32 = arith.constant 0 : i32
    %c0_i32_0 = arith.constant 0 : i32
    %c0_i32_1 = arith.constant 0 : i32
    return %c0_i32, %c0_i32_0 : i32, i32
  }
  func.func @transform_21(%arg0: i32, %arg1: i32) -> (i32, i32) {
    %c0_i32 = arith.constant 0 : i32
    %c0_i32_0 = arith.constant 0 : i32
    return %arg0, %c0_i32 : i32, i32
  }
}

</mosaic_0001>

<bundles_post_ra>
// kernel: gvp_forward.2
= control target key start
LH: loop header
LB: loop body
LE: loop exit
PB: predicated region body
PF: predicated region fallthrough
CT: control target
= control target key end

     0   :  { %s3409_s25 = smov 0   ;;  %s3411_s26 = smov 0   ;;  %s3716_s0 = inlined_call_operand.vmem [shape: f32[24,56], index: 0, kind: input, shape index: {}]   ;;  %s3717_s1 = inlined_call_operand.vmem [shape: f32[4,24,57], index: 1, kind: input, shape index: {}]   ;;  %s3718_s2 = inlined_call_operand.vmem [shape: f32[8,48], index: 2, kind: input, shape index: {}]   ;;  %s3719_s3 = inlined_call_operand.vmem [shape: f32[8,48], index: 3, kind: input, shape index: {}]   ;;  %s3720_s4 = inlined_call_operand.vmem [shape: f32[32,32], index: 4, kind: input, shape index: {}]   ;;  %s3721_s5 = inlined_call_operand.vmem [shape: f32[32,32], index: 5, kind: input, shape index: {}]   ;;  %s3722_s6 = inlined_call_operand.vmem [shape: f32[1,32], index: 6, kind: input, shape index: {}]   ;;  %s3723_s7 = inlined_call_operand.vmem [shape: f32[16,32], index: 7, kind: input, shape index: {}]   ;;  %s3724_s8 = inlined_call_operand.vmem [shape: f32[1,32], index: 8, kind: input, shape index: {}]   ;;  %s3725_s9 = inlined_call_operand.vmem [shape: f32[16,8], index: 9, kind: input, shape index: {}]   ;;  %s3726_s10 = inlined_call_operand.vmem [shape: f32[1,32], index: 10, kind: input, shape index: {}]   ;;  %s3727_s11 = inlined_call_operand.vmem [shape: f32[1,32], index: 11, kind: input, shape index: {}]   ;;  %s3728_s12 = inlined_call_operand.vmem [shape: f32[8,48], index: 12, kind: input, shape index: {}]   ;;  %s3729_s13 = inlined_call_operand.vmem [shape: f32[8,48], index: 13, kind: input, shape index: {}]   ;;  %s3730_s14 = inlined_call_operand.vmem [shape: f32[32,32], index: 14, kind: input, shape index: {}]   ;;  %s3731_s15 = inlined_call_operand.vmem [shape: f32[32,32], index: 15, kind: input, shape index: {}]   ;;  %s3732_s16 = inlined_call_operand.vmem [shape: f32[16,32], index: 16, kind: input, shape index: {}]   ;;  %s3733_s17 = inlined_call_operand.vmem [shape: f32[1,32], index: 17, kind: input, shape index: {}]   ;;  %s3734_s18 = inlined_call_operand.vmem [shape: f32[16,8], index: 18, kind: input, shape index: {}]   ;;  %s3735_s19 = inlined_call_operand.vmem [shape: f32[1,32], index: 19, kind: input, shape index: {}]   ;;  %s3736_s20 = inlined_call_operand.vmem [shape: f32[1,32], index: 20, kind: input, shape index: {}]   ;;  %s3737_s21 = inlined_call_operand.vmem [shape: f32[24,56], index: 21, kind: output, shape index: {}]  }
   0x1   :  { %3743 = sst [smem:[#allocation9_spill]] %s3716_s0  ;;  %s3413_s27 = smov 0  }
   0x2   :  { %3744 = sst [smem:[#allocation10_spill]] %s3717_s1 }
   0x3   :  { %3745 = sst [smem:[#allocation11_spill]] %s3718_s2  ;;  %s3407_s2 = smov 0  }
   0x4   :  { %3746 = sst [smem:[#allocation12_spill]] %s3719_s3  ;;  %s3415_s3 = smov 0  }
   0x5   :  { %3747 = sst [smem:[#allocation13_spill]] %s3720_s4 }
   0x6   :  { %3748 = sst [smem:[#allocation14_spill]] %s3721_s5 }
   0x7   :  { %3749 = sst [smem:[#allocation15_spill]] %s3733_s17 }
   0x8   :  { %3750 = sst [smem:[#allocation16_spill]] %s3735_s19 }
   0x9   :  { %3751 = sst [smem:[#allocation17_spill]] %s3736_s20 }
   0xa LB: > { %3752 = sst [smem:[#allocation4_spill]] %s3270_s26  ;;  %s40_s28 = sadd.s32 1, %s3270_s26  ;;  %s3278_s3 = sphi %s3415_s3, %s31_s3   ;;  %s3274_s27 = sphi %s3413_s27, %s3770_s27   ;;  %s3270_s26 = sphi %s3411_s26, %s3769_s26   ;;  %s3266_s25 = sphi %s3409_s25, %s3768_s25   ;;  %s3262_s2 = sphi %s3407_s2, %s3767_s2  }
   0xb   : > { %3753 = sst [smem:[#allocation5_spill]] %s3274_s27  ;;  %s43_s29 = sadd.s32 1, %s3274_s27 }
   0xc   : > { %3754 = sst [smem:[#allocation6_spill]] %s3278_s3  ;;  %p41_p0 = scmp.ge.s32.totalorder %s40_s28, 4 }
   0xd   : > { %p2827_p1 = scmp.ge.s32.totalorder %s3278_s3, 1  ;;  %p613_p2 = scmp.lt.s32.totalorder %s3278_s3, 13 }
   0xe   : > { %s3772_s28 = smov (%p41_p0, %s40_s28), 0  ;;  %s3774_s29 = smov (!%p41_p0, %s43_s29), %s3274_s27 }
   0xf   : > { %3755 = sst [smem:[#allocation7_spill]] %s3772_s28  ;;  %p614_p3 = pnand %p2827_p1, %p613_p2 }
  0x10   : > { %p45_p4 = scmp.ge.s32.totalorder %s3774_s29, 3  ;;  %p679_p5 = scmp.lt.s32.totalorder (!%p614_p3), %s3266_s25, 2 }
  0x11   : > { %617 = sbr.rel (%p614_p3) target bundleno = 1866 (0x74a), region = 104  ;;  %p683_p6 = scmp.lt.s32.totalorder (!%p614_p3), %s3262_s2, 3 }
  0x12   : > { %s3776_s29 = smov (%p45_p4, %s3774_s29), 0  ;;  %s3757_s22 = sld [smem:[#allocation9_spill]] (!%p614_p3) }
  0x13   : > { %3756 = sst [smem:[#allocation8_spill]] %s3776_s29  ;;  %s3758_s19 = sld [smem:[#allocation10_spill]] (!%p614_p3) }
  0x14   : > { %p2831_p7 = scmp.ne.s32.totalorder (!%p614_p3), %s3262_s2, 0 }
  0x18   : > { %s3778_s25 = smov (!%p679_p5, %s3266_s25), 2  ;;  %vm699_vm0 = vcmask (!%p2831_p7), 261120   ;;  %vm701_vm1 = vcmask (!%p2831_p7), 64512   ;;  %v3280_v0 = vmov (!%p2831_p7), 0.0  }
  0x19   : > { %s684_s0 = scalar_select %p683_p6, %s3262_s2, 3 }
  0x1a   : > { %s2828_s4 = sshll.u32 %s3778_s25, 3  ;;  %698 = sbr.rel (%p2831_p7) target bundleno = 33 (0x21), region = 108  ;;  %700 = vst.msk [vmem:[#allocation2] sm:$0xff] (!%p2831_p7), %vm699_vm0, %v3280_v0 }
  0x1b   : > { %s682_s23 = scalar_lea.vmem %s3757_s22, %s2828_s4  ;;  %s3161_s1 = smul.u32 3, %s684_s0  ;;  %702 = vst.msk [vmem:[#allocation3] sm:$0xff] (!%p2831_p7), %vm701_vm1, %v3280_v0  ;;  %703 = vst.msk [vmem:[#allocation3 + $0x8] sm:$0xff] (!%p2831_p7), %vm701_vm1, %v3280_v0 }
  0x1c   : > { %s3447_s27 = scalar_lea.vmem %s3737_s21, %s2828_s4  ;;  %704 = vst.msk [vmem:[#allocation3 + $0x10] sm:$0xff] (!%p2831_p7), %vm701_vm1, %v3280_v0 }
  0x1d   : > { %s688_s26 = sadd.s32 %s3161_s1, %s3778_s25 }
  0x1e   : > { %s2829_s29 = sshll.u32 %s688_s26, 3 }
  0x1f   : > { %s690_s17 = scalar_lea.vmem %s3758_s19, %s2829_s29 }
  0x21 PF: > { %v3453_v1 = vld [vmem:[%s690_s17] sm:$0xff]  ;;  %s3759_s26 = sld [smem:[#allocation12_spill]]  ;;  %s3281_s0 = smov 88   ;;  %v3283_v4 = vmov 0.0   ;;  %vm3284_vm2 = vmmov 0   ;;  %vm726_vm3 = vcmask 64512  }
  0x22   : > { %874 = vrot.lane.b32.xlu1 %v3453_v1, %s3281_s0  ;;  %s3282_s19 = smov 96   ;;  %v3461_v3 = vld [vmem:[%s682_s23] sm:$0xff]  ;;  %2936 = vmatprep.subr.mxu0 %v3283_v4  ;;  %s3285_s17 = smov 80   ;;  %v3286_v17 = vmov 0.0|0.0   ;;  %v719_v20 = vld [vmem:[%s3723_s7 + $0x8] sm:$0xff]  ;;  %vm1267_vm4 = vcmask 261120  }
  0x23   : > { %724 = vrot.lane.b32.xlu0 %v3453_v1, %s3282_s19  ;;  %2946 = vmatprep.subr.mxu1 %v3283_v4  ;;  %s3760_s29 = sld [smem:[#allocation11_spill]]  ;;  %s3761_s5 = sld [smem:[#allocation14_spill]]  ;;  %v718_v19 = vld [vmem:[%s3723_s7] sm:$0xff]  ;;  %v722_v23 = vld [vmem:[%s3725_s9 + $0x8] sm:$0xff]  ;;  %v3288_v31 = vmov 56   ;;  %vm1193_vm5 = vcmask 130048  }
  0x24   : > { %2938 = vmatprep.mubr.msk.f32.mxu0 %vm3284_vm2, %v3283_v4  ;;  %2948 = vmatprep.mubr.msk.f32.mxu1 %vm3284_vm2, %v3283_v4  ;;  %v3097_v21 = vpack.c.bf16 %v719_v20, %v718_v19  ;;  %v721_v22 = vld [vmem:[%s3725_s9] sm:$0xff]  ;;  %s3287_s22 = smov 112   ;;  %s3762_s24 = sld [smem:[#allocation13_spill]] }
  0x25   : > { %v3112_v24 = vpack.c.bf16 %v722_v23, %v721_v22  ;;  %3219 = vset.pattern.permute.xlu0 %v3288_v31  ;;  %v2838_v55 = vld [vmem:[%s3724_s8] ss:$0 sm:$0xff]  ;;  %p2849_p8 = scmp.ne.s32.totalorder %s3262_s2, 3 }
  0x26   : > { %1022 = vrot.lane.b32.xlu1 %v3453_v1, %s3285_s17  ;;  %v2842_v56 = vld [vmem:[%s3722_s6] ss:$0 sm:$0xff]  ;;  %vm3290_vm8 = vmmov (!%p2849_p8), 0   ;;  %s3292_s3 = smov (!%p2849_p8), 96   ;;  %s3293_s23 = smov (!%p2849_p8), 112   ;;  %vm2723_vm11 = vcmask (!%p2849_p8), 326912  }
  0x27   : > { %v717_v2 = vld [vmem:[%s3759_s26] sm:$0xff]  ;;  %800 = vrot.lane.b32.xlu0 %v3461_v3, %s3282_s19  ;;  %s3294_s26 = smov (!%p2849_p8), 40   ;;  %s3295_s2 = smov (!%p2849_p8), 32   ;;  %vm2731_vm12 = vcmask (!%p2849_p8), 392512   ;;  %vm2739_vm13 = vcmask (!%p2849_p8), 458112  }
  0x28   : > { %2937 = vmatpush3.msra.mxu0 %v717_v2  ;;  %2947 = vmatpush3.msra.mxu1 %v717_v2  ;;  %s3765_s30 = sld [smem:[#allocation17_spill]] (!%p2849_p8) }
  0x29   : > { %2941 = vmatprep.subr.mxu0 %v3283_v4  ;;  %2951 = vmatprep.subr.mxu1 %v3283_v4  ;;  %v716_v5 = vld [vmem:[%s3760_s29] sm:$0xff]  ;;  %v712_v13 = vld [vmem:[%s3761_s5 + $0x8] sm:$0xff]  ;;  %v713_v15 = vld [vmem:[%s3761_s5 + $0x10] sm:$0xff] }
  0x2a   : > { %1096 = vrot.lane.b32.xlu1 %v3461_v3, %s3285_s17  ;;  %v711_v12 = vld [vmem:[%s3761_s5] sm:$0xff]  ;;  %v714_v16 = vld [vmem:[%s3761_s5 + $0x18] sm:$0xff]  ;;  %v708_v38 = vld [vmem:[%s3762_s24 + $0x8] sm:$0xff] }
  0x2b   : > { %948 = vrot.lane.b32.xlu0 %v3461_v3, %s3281_s0  ;;  %v3106_v14 = vpack.c.bf16 %v712_v13, %v711_v12  ;;  %v3109_v18 = vpack.c.bf16 %v714_v16, %v713_v15  ;;  %v707_v37 = vld [vmem:[%s3762_s24] sm:$0xff]  ;;  %v709_v43 = vld [vmem:[%s3762_s24 + $0x10] sm:$0xff]  ;;  %v710_v44 = vld [vmem:[%s3762_s24 + $0x18] sm:$0xff]  ;;  %s3296_s0 = smov (!%p2849_p8), 48  }
  0x2c   : > { %v3100_v41 = vpack.c.bf16 %v708_v38, %v707_v37  ;;  %v3103_v46 = vpack.c.bf16 %v710_v44, %v709_v43  ;;  %v1719_v44 = vld [vmem:[#allocation3] sm:$0xff] }
  0x94   : > { %v875_v6 = vpop.permute.xlu1 %874 }
  0x95   : > { %v725_v7 = vpop.permute.xlu0 %724  ;;  %2949 = vmatmul.mubr.msk.f32.vlgmr.msra.gmra.mrb[0].mxu1 %vm726_vm3, %v875_v6 }
  0x96   : > { %2939 = vmatmul.mubr.msk.f32.vlgmr.msra.gmra.mrb[0].mxu0 %vm726_vm3, %v725_v7  ;;  %2952 = vmatpush3.msra.mxu1 %v716_v5 }
  0x97   : > { %2942 = vmatpush3.msra.mxu0 %v716_v5  ;;  %2943 = vmatprep.mubr.msk.f32.mxu0 %vm3284_vm2, %v3283_v4 }
  0x98   : > { %2953 = vmatprep.mubr.msk.f32.mxu1 %vm3284_vm2, %v3283_v4  ;;  %2956 = vmatprep.subr.mxu0 %v3283_v4  ;;  %v1023_v10 = vpop.permute.xlu1 %1022 }
  0x99   : > { %v3485_v8 = vpop.permute.xlu0 %800  ;;  %3096 = vmatprep.subr.bf16.mxu1 %v3286_v17 }
  0x9c   : > { %v3502_v11 = vpop.permute.xlu1 %1096 }
  0x9d   : > { %v3488_v9 = vpop.permute.xlu0 %948 }
  0x9e   : > { %2944 = vmatmul.mubr.msk.f32.vlgmr.msra.gmra.mrb[0].mxu0 %vm726_vm3, %v3485_v8  ;;  %2954 = vmatmul.mubr.msk.f32.vlgmr.msra.gmra.mrb[0].mxu1 %vm726_vm3, %v3488_v9 }
  0x9f   : > { %2957 = vmatpush3.msra.mxu0 %v717_v2  ;;  %2958 = vmatprep.mubr.msk.f32.mxu0 %vm3284_vm2, %v3283_v4 }
  0xa0   : > { %2961 = vmatprep.subr.mxu0 %v3283_v4  ;;  %2970 = vmatprep.mubr.msk.f32.mxu1 %vm3284_vm2, %v3283_v4 }
  0xa1   : > { %3098 = vmatpush3.bf16.msra.mxu1 %v3097_v21 }
  0xa2   : > { %2959 = vmatmul.mubr.msk.f32.vlgmr.msra.gmra.mrb[2].mxu0 %vm726_vm3, %v1023_v10  ;;  %3099 = vmatprep.subr.bf16.mxu1 %v3286_v17 }
  0xa3   : > { %2962 = vmatpush3.msra.mxu0 %v716_v5  ;;  %2963 = vmatprep.mubr.msk.f32.mxu0 %vm3284_vm2, %v3283_v4 }
  0xa4   : > { %3105 = vmatprep.subr.bf16.mxu0 %v3286_v17 }
  0xaa   : > { %2964 = vmatmul.mubr.msk.f32.vlgmr.msra.gmra.mrb[2].mxu0 %vm726_vm3, %v3502_v11 }
  0xab   : > { %2992 = vmatprep.mubr.msk.f32.mxu0 %vm3284_vm2, %v3283_v4  ;;  %3107 = vmatpush3.bf16.msra.mxu0 %v3106_v14 }
  0xac   : > { %3108 = vmatprep.subr.bf16.mxu0 %v3286_v17 }
  0xaf   : > { %3110 = vmatpush3.bf16.msra.mxu0 %v3109_v18 }
  0xb0   : > { %3114 = vmatprep.subr.bf16.mxu0 %v3286_v17 }
  0xb2   : > { %2993 = vmatmul.mubr.msk.f32.vlgmr.msra.gmra.mrb[4].mxu0 %vm1267_vm4, %v3453_v1 }
  0xb3   : > { %3116 = vmatpush3.bf16.msra.mxu0 %v3112_v24  ;;  %3006 = vmatprep.mubr.msk.f32.mxu0 %vm3284_vm2, %v3283_v4 }
 0x171   : > { %v870_v25 = vpop.f32.mrb[0].mxu0  ;;  %v1018_v26 = vpop.f32.mrb[0].mxu1 }
 0x172   : > { %1171 = vrot.lane.b32.xlu0 %v870_v25, %s3287_s22  ;;  %v2945_v27 = vpop.f32.mrb[1].mxu0  ;;  %1176 = vrot.lane.b32.xlu1 %v1018_v26, %s3287_s22  ;;  %v2955_v28 = vpop.f32.mrb[1].mxu1 }
 0x176   : > { %1426 = vrot.lane.b32.xlu1 %v870_v25, %s3282_s19 }
 0x17d   : > { %v1166_v29 = vpop.f32.mrb[2].mxu0 }
 0x17e   : > { %1182 = vrot.lane.b32.xlu0 %v1166_v29, %s3287_s22  ;;  %v2965_v30 = vpop.f32.mrb[3].mxu0  ;;  %1574 = vrot.lane.b32.xlu1 %v1166_v29, %s3282_s19 }
 0x182   : > { %1500 = vrot.lane.b32.xlu0 %v1018_v26, %s3282_s19  ;;  %s3763_s19 = sld [smem:[#allocation15_spill]] (!%p2849_p8) }
 0x185   : > { %v1409_v49 = vpop.f32.mrb[4].mxu0 }
 0x186   : > { %1415 = vperm.xlu0 %3219, %v3453_v1   ;;  %v2994_v50 = vpop.f32.mrb[5].mxu0 }
 0x1e4   : > { %v1177_v32 = vpop.permute.xlu1 %1176  ;;  %v1172_v33 = vpop.permute.xlu0 %1171 }
 0x1e5   : > { %v1179_v34 = vmul.f32 %v1177_v32, %v1018_v26  ;;  %v1174_v35 = vmul.f32 %v1172_v33, %v870_v25 }
 0x1e7   : > { %v1180_v36 = vadd.f32 %v1179_v34, %v1174_v35 }
 0x1e8   : > { %v1427_v47 = vpop.permute.xlu1 %1426 }
 0x1f0   : > { %v1183_v39 = vpop.permute.xlu0 %1182  ;;  %v1575_v48 = vpop.permute.xlu1 %1574 }
 0x1f1   : > { %v1185_v40 = vmul.f32 %v1183_v39, %v1166_v29 }
 0x1f3   : > { %v1186_v42 = vadd.f32 %v1185_v40, %v1180_v36 }
 0x1f4   : > { %v1501_v45 = vpop.permute.xlu0 %1500 }
 0x1f5   : > { %2971 = vmatmul.mubr.msk.f32.vlgmr.msra.gmra.mrb[2].mxu1 %vm1193_vm5, %v1186_v42  ;;  %3007 = vmatmul.mubr.msk.f32.vlgmr.msra.gmra.mrb[6].mxu0 %vm1193_vm5, %v1501_v45  ;;  %v1723_v45 = vld [vmem:[#allocation3 + $0x8] sm:$0xff] }
 0x1f6   : > { %3101 = vmatpush3.bf16.msra.mxu1 %v3100_v41  ;;  %2981 = vmatprep.mubr.msk.f32.mxu1 %vm3284_vm2, %v3283_v4 }
 0x1f7   : > { %3102 = vmatprep.subr.bf16.mxu1 %v3286_v17 }
 0x1fa   : > { %3104 = vmatpush3.bf16.msra.mxu1 %v3103_v46  ;;  %v1727_v46 = vld [vmem:[#allocation3 + $0x10] sm:$0xff] }
 0x1fb   : > { %3111 = vmatprep.subr.bf16.mxu1 %v3286_v17 }
 0x1fd   : > { %2982 = vmatmul.mubr.msk.f32.vlgmr.msra.gmra.mrb[4].mxu1 %vm1267_vm4, %v3461_v3 }
 0x1fe   : > { %3113 = vmatpush3.bf16.msra.mxu1 %v3112_v24  ;;  %2999 = vmatprep.mubr.msk.f32.mxu1 %vm3284_vm2, %v3283_v4 }
 0x1ff   : > { %3117 = vmatprep.subr.bf16.mxu1 %v3286_v17 }
 0x201   : > { %3000 = vmatmul.mubr.msk.f32.vlgmr.msra.gmra.mrb[6].mxu1 %vm1193_vm5, %v1427_v47 }
 0x202   : > { %3119 = vmatpush3.bf16.msra.mxu1 %v3112_v24  ;;  %3013 = vmatprep.mubr.msk.f32.mxu1 %vm3284_vm2, %v3283_v4 }
 0x205   : > { %3014 = vmatmul.mubr.msk.f32.vlgmr.msra.gmra.mrb[8].mxu1 %vm1193_vm5, %v1575_v48  ;;  %v1416_v57 = vpop.permute.xlu0 %1415 }
 0x206   : > { %v1424_v62 = vmul.f32 %v2842_v56, %v1416_v57  ;;  %v2847_v57 = vld [vmem:[%s3726_s10] ss:$0 sm:$0xff] }
 0x2c8   : > { %v1263_v51 = vpop.f32.mrb[2].mxu1  ;;  %v1570_v52 = vpop.f32.mrb[6].mxu0 }
 0x2c9   : > { %v2972_v53 = vpop.f32.mrb[3].mxu1  ;;  %v3008_v54 = vpop.f32.mrb[7].mxu0  ;;  %v1264_v58 = vadd.f32 %v2838_v55, %v1263_v51  ;;  %v1649_v1 = vmul.f32 %v1570_v52, %v1570_v52 }
 0x2d0   : > { %v1336_v59 = vpop.f32.mrb[4].mxu1 }
 0x2d1   : > { %v1340_v60 = vadd.f32 %v1336_v59, %v1264_v58  ;;  %v2983_v61 = vpop.f32.mrb[5].mxu1  ;;  %v2848_v59 = vld [vmem:[%s3727_s11] ss:$0 sm:$0xff] }
 0x2d2   : > { %v1716_v61 = vld [vmem:[#allocation2] sm:$0xff] }
 0x2d3   : > { %v1413_v63 = vadd.f32 %v1409_v49, %v1340_v60 }
 0x2d4   : > { %v1496_v0 = vpop.f32.mrb[6].mxu1 }
 0x2d5   : > { %v1425_v2 = vadd.f32 %v1424_v62, %v1413_v63  ;;  %v1648_v4 = vmul.f32 %v1496_v0, %v1496_v0  ;;  %v3001_v5 = vpop.f32.mrb[7].mxu1 }
 0x2d6   : > { %v1750_v5 = vld [vmem:[%s3728_s12] sm:$0xff] (!%p2849_p8) }
 0x2d7   : > { %v1650_v6 = vadd.f32 %v1649_v1, %v1648_v4  ;;  %v1670_v7 = vmax.f32 %v1425_v2, 0.0  ;;  %v3289_v2 = vmov (!%p2849_p8), 0.0  }
 0x2d8   : > { %v1644_v10 = vpop.f32.mrb[8].mxu1  ;;  %3016 = vmatprep.subr.mxu0 (!%p2849_p8), %v3289_v2  ;;  %3018 = vmatprep.mubr.msk.f32.mxu0 (!%p2849_p8), %vm3290_vm8, %v3289_v2 }
 0x2d9   : > { %v1651_v12 = vmul.f32 %v1644_v10, %v1644_v10  ;;  %v3015_v13 = vpop.f32.mrb[9].mxu1  ;;  %v1673_v14 = vsel %vm1267_vm4, %v1670_v7, 0.0  ;;  %3026 = vmatprep.subr.mxu1 (!%p2849_p8), %v3289_v2  ;;  %3028 = vmatprep.mubr.msk.f32.mxu1 (!%p2849_p8), %vm3290_vm8, %v3289_v2 }
 0x2da   : > { %1674 = vadd.xlane.f32.xlu1 %v1673_v14  ;;  %v1755_v13 = vld [vmem:[%s3734_s18] sm:$0xff] (!%p2849_p8)  ;;  %v1756_v14 = vld [vmem:[%s3734_s18 + $0x8] sm:$0xff] (!%p2849_p8) }
 0x2db   : > { %v1652_v15 = vadd.f32 %v1651_v12, %v1650_v6 }
 0x2dd   : > { %v1653_v16 = vmax.f32 %v1652_v15, 1e-08  ;;  %v3291_v15 = vmov (!%p2849_p8), 0.0|0.0  }
 0x2df   : > { %3220 = vrsqrt.f32 %v1653_v16  ;;  %vm1656_vm6 = vcmp.eq.f32.partialorder %v1653_v16, inf  ;;  %v1659_v19 = vand.u32 2147483648, %v1653_v16  ;;  %vm1658_vm7 = vcmp.eq.f32.partialorder %v1653_v16, 0.0 }
 0x2e9   : > { %v3221_v17 = vpop.eup %3220 }
 0x2ea   : > { %v1655_v18 = vmul.f32 %v3221_v17, %v1653_v16 }
 0x2ec   : > { %v1657_v20 = vsel %vm1656_vm6, %v1653_v16, %v1655_v18  ;;  %v3136_v16 = vpack.c.bf16 (!%p2849_p8), %v1756_v14, %v1755_v13 }
 0x2ed   : > { %v1660_v21 = vsel %vm1658_vm7, %v1659_v19, %v1657_v20 }
 0x2ee   : > { %v2846_v22 = vmul.f32 -1.442695, %v1660_v21  ;;  %v1752_v21 = vld [vmem:[%s3732_s16] sm:$0xff] (!%p2849_p8) }
 0x2f0   : > { %3222 = vpow2.f32 %v2846_v22  ;;  %v1753_v22 = vld [vmem:[%s3732_s16 + $0x8] sm:$0xff] (!%p2849_p8) }
 0x2fa   : > { %v3223_v23 = vpop.eup %3222 }
 0x2fb   : > { %v1664_v24 = vadd.f32 1.0, %v3223_v23  ;;  %v3121_v23 = vpack.c.bf16 (!%p2849_p8), %v1753_v22, %v1752_v21 }
 0x2fd   : > { %3224 = vrcp.f32 %v1664_v24 }
 0x307   : > { %v3225_v25 = vpop.eup %3224 }
 0x308   : > { %v1669_v26 = vmul.f32 %v3225_v25, %v1644_v10  ;;  %v1667_v27 = vmul.f32 %v3225_v25, %v1496_v0  ;;  %v1668_v28 = vmul.f32 %v3225_v25, %v1570_v52  ;;  %v1751_v0 = vld [vmem:[%s3729_s13] sm:$0xff] (!%p2849_p8) }
 0x309   : > { %3017 = vmatpush3.msra.mxu0 (!%p2849_p8), %v1751_v0  ;;  %3027 = vmatpush3.msra.mxu1 (!%p2849_p8), %v1751_v0 }
 0x30a   : > { %v1701_v29 = vmul.f32 %v1667_v27, %v1667_v27  ;;  %v1702_v30 = vmul.f32 %v1668_v28, %v1668_v28  ;;  %v1704_v31 = vmul.f32 %v1669_v26, %v1669_v26  ;;  %3021 = vmatprep.subr.mxu0 (!%p2849_p8), %v3289_v2  ;;  %3031 = vmatprep.subr.mxu1 (!%p2849_p8), %v3289_v2 }
 0x30c   : > { %v1703_v32 = vadd.f32 %v1702_v30, %v1701_v29 }
 0x30e   : > { %v1705_v33 = vadd.f32 %v1704_v31, %v1703_v32 }
 0x310   : > { %v1706_v34 = vmax.f32 %v1705_v33, 1e-08 }
 0x312   : > { %v1707_v35 = vsel %vm726_vm3, %v1706_v34, 0.0  ;;  %v1742_v34 = vld [vmem:[%s3730_s14] sm:$0xff] (!%p2849_p8) }
 0x313   : > { %1708 = vadd.xlane.f32.xlu1 %v1707_v35  ;;  %v1743_v35 = vld [vmem:[%s3730_s14 + $0x8] sm:$0xff] (!%p2849_p8) }
 0x367   : > { %v1675_v36 = vpop.xlane.xlu1 %1674 }
 0x368   : > { %v1677_v37 = vmul.f32 0.03125, %v1675_v36 }
 0x36a   : > { %v1678_v38 = vsub.f32 %v1670_v7, %v1677_v37 }
 0x36c   : > { %v1679_v39 = vmul.f32 %v1678_v38, %v1678_v38 }
 0x36e   : > { %v1680_v40 = vsel %vm1267_vm4, %v1679_v39, 0.0 }
 0x36f   : > { %1681 = vadd.xlane.f32.xlu0 %v1680_v40  ;;  %v1744_v40 = vld [vmem:[%s3730_s14 + $0x10] sm:$0xff] (!%p2849_p8) }
 0x3a0   : > { %v1709_v41 = vpop.xlane.xlu1 %1708 }
 0x3a1   : > { %v1711_v42 = vmul.f32 0.125, %v1709_v41  ;;  %v1745_v41 = vld [vmem:[%s3730_s14 + $0x18] sm:$0xff] (!%p2849_p8) }
 0x3a3   : > { %3226 = vrsqrt.f32 %v1711_v42  ;;  %v3127_v42 = vpack.c.bf16 (!%p2849_p8), %v1745_v41, %v1744_v40 }
 0x3ad   : > { %v3227_v43 = vpop.eup %3226 }
 0x3ae   : > { %v1713_v47 = vmul.f32 %v3227_v43, %v1667_v27  ;;  %v1714_v48 = vmul.f32 %v3227_v43, %v1668_v28  ;;  %v1715_v49 = vmul.f32 %v3227_v43, %v1669_v26  ;;  %v1746_v43 = vld [vmem:[%s3731_s15] sm:$0xff] (!%p2849_p8) }
 0x3b0   : > { %v1720_v50 = vadd.f32 %v1719_v44, %v1713_v47  ;;  %v1724_v51 = vadd.f32 %v1723_v45, %v1714_v48  ;;  %v1728_v52 = vadd.f32 %v1727_v46, %v1715_v49  ;;  %v1747_v44 = vld [vmem:[%s3731_s15 + $0x8] sm:$0xff] (!%p2849_p8)  ;;  %v1748_v46 = vld [vmem:[%s3731_s15 + $0x10] sm:$0xff] (!%p2849_p8)  ;;  %v1749_v47 = vld [vmem:[%s3731_s15 + $0x18] sm:$0xff] (!%p2849_p8) }
 0x3b1   : > { %v3130_v45 = vpack.c.bf16 (!%p2849_p8), %v1747_v44, %v1746_v43  ;;  %v3133_v48 = vpack.c.bf16 (!%p2849_p8), %v1749_v47, %v1748_v46 }
 0x3b2   : > { %1721 = vst.msk [vmem:[#allocation3] sm:$0xff] %vm726_vm3, %v1720_v50  ;;  %1725 = vst.msk [vmem:[#allocation3 + $0x8] sm:$0xff] %vm726_vm3, %v1724_v51 }
 0x3b3   : > { %1729 = vst.msk [vmem:[#allocation3 + $0x10] sm:$0xff] %vm726_vm3, %v1728_v52 }
 0x3b9   : > { %v1736_v1 = vld [vmem:[#allocation3] sm:$0xff] (!%p2849_p8)  ;;  %v1738_v6 = vld [vmem:[#allocation3 + $0x8] sm:$0xff] (!%p2849_p8) }
 0x3ba   : > { %v1737_v4 = vmul.f32 (!%p2849_p8), 0.5, %v1736_v1  ;;  %v1739_v7 = vmul.f32 (!%p2849_p8), 0.5, %v1738_v6  ;;  %v1740_v10 = vld [vmem:[#allocation3 + $0x10] sm:$0xff] (!%p2849_p8)  ;;  %v2856_v6 = vld [vmem:[%s3763_s19] ss:$0 sm:$0xff] (!%p2849_p8) }
 0x3bb   : > { %v1741_v12 = vmul.f32 (!%p2849_p8), 0.5, %v1740_v10 }
 0x3bc   : > { %3019 = vmatmul.mubr.msk.f32.vlgmr.msra.gmra.mrb[0].mxu0 (!%p2849_p8), %vm726_vm3, %v1737_v4  ;;  %3029 = vmatmul.mubr.msk.f32.vlgmr.msra.gmra.mrb[0].mxu1 (!%p2849_p8), %vm726_vm3, %v1739_v7 }
 0x3bd   : > { %3022 = vmatpush3.msra.mxu0 (!%p2849_p8), %v1750_v5  ;;  %3023 = vmatprep.mubr.msk.f32.mxu0 (!%p2849_p8), %vm3290_vm8, %v3289_v2 }
 0x3be   : > { %3036 = vmatprep.subr.mxu0 (!%p2849_p8), %v3289_v2  ;;  %3033 = vmatprep.mubr.msk.f32.mxu1 (!%p2849_p8), %vm3290_vm8, %v3289_v2 }
 0x3bf   : > { %3032 = vmatpush3.msra.mxu1 (!%p2849_p8), %v1750_v5 }
 0x3c0   : > { %3120 = vmatprep.subr.bf16.mxu1 (!%p2849_p8), %v3291_v15 }
 0x3c4   : > { %3024 = vmatmul.mubr.msk.f32.vlgmr.msra.gmra.mrb[0].mxu0 (!%p2849_p8), %vm726_vm3, %v3485_v8  ;;  %3034 = vmatmul.mubr.msk.f32.vlgmr.msra.gmra.mrb[0].mxu1 (!%p2849_p8), %vm726_vm3, %v3488_v9 }
 0x3c5   : > { %3037 = vmatpush3.msra.mxu0 (!%p2849_p8), %v1751_v0  ;;  %3038 = vmatprep.mubr.msk.f32.mxu0 (!%p2849_p8), %vm3290_vm8, %v3289_v2 }
 0x3c6   : > { %3041 = vmatprep.subr.mxu0 (!%p2849_p8), %v3289_v2  ;;  %3050 = vmatprep.mubr.msk.f32.mxu1 (!%p2849_p8), %vm3290_vm8, %v3289_v2 }
 0x3c7   : > { %3122 = vmatpush3.bf16.msra.mxu1 (!%p2849_p8), %v3121_v23 }
 0x3c8   : > { %3039 = vmatmul.mubr.msk.f32.vlgmr.msra.gmra.mrb[2].mxu0 (!%p2849_p8), %vm726_vm3, %v1741_v12  ;;  %3123 = vmatprep.subr.bf16.mxu1 (!%p2849_p8), %v3291_v15 }
 0x3c9   : > { %3042 = vmatpush3.msra.mxu0 (!%p2849_p8), %v1750_v5  ;;  %3043 = vmatprep.mubr.msk.f32.mxu0 (!%p2849_p8), %vm3290_vm8, %v3289_v2 }
 0x3ca   : > { %3135 = vmatprep.subr.bf16.mxu0 (!%p2849_p8), %v3291_v15 }
 0x3d0   : > { %3044 = vmatmul.mubr.msk.f32.vlgmr.msra.gmra.mrb[2].mxu0 (!%p2849_p8), %vm726_vm3, %v3502_v11 }
 0x3d1   : > { %3079 = vmatprep.mubr.msk.f32.mxu0 (!%p2849_p8), %vm3290_vm8, %v3289_v2  ;;  %3137 = vmatpush3.bf16.msra.mxu0 (!%p2849_p8), %v3136_v16 }
 0x3d2   : > { %3138 = vmatprep.subr.bf16.mxu0 (!%p2849_p8), %v3291_v15 }
 0x3fc   : > { %v1682_v53 = vpop.xlane.xlu0 %1681 }
 0x3fd   : > { %v1683_v54 = vmul.f32 0.03125, %v1682_v53 }
 0x3ff   : > { %v1684_v55 = vadd.f32 1e-05, %v1683_v54 }
 0x401   : > { %3228 = vrsqrt.f32 %v1684_v55 }
 0x40b   : > { %v3229_v56 = vpop.eup %3228 }
 0x40c   : > { %v1686_v58 = vmul.f32 %v3229_v56, %v1678_v38  ;;  %v3124_v38 = vpack.c.bf16 (!%p2849_p8), %v1743_v35, %v1742_v34 }
 0x40e   : > { %v1693_v60 = vmul.f32 %v2847_v57, %v1686_v58  ;;  %1733 = sbr.rel (%p2849_p8) target bundleno = 1866 (0x74a), region = 112 }
 0x410   : > { %v1700_v62 = vadd.f32 %v2848_v59, %v1693_v60 }
 0x412   : > { %v1717_v63 = vadd.f32 %v1716_v61, %v1700_v62 }
 0x414   : > { %1718 = vst.msk [vmem:[#allocation2] sm:$0xff] %vm1267_vm4, %v1717_v63 }
 0x41b   : > { %v1734_v49 = vld [vmem:[#allocation2] sm:$0xff] }
 0x41c   : > { %v1735_v50 = vmul.f32 0.5, %v1734_v49 }
 0x497   : > { %v1896_v17 = vpop.f32.mrb[0].mxu0  ;;  %v2039_v19 = vpop.f32.mrb[0].mxu1 }
 0x498   : > { %2427 = vrot.lane.b32.xlu0 %v1896_v17, %s3292_s3  ;;  %v3025_v18 = vpop.f32.mrb[1].mxu0  ;;  %v3035_v20 = vpop.f32.mrb[1].mxu1 }
 0x49c   : > { %2501 = vrot.lane.b32.xlu0 %v2039_v19, %s3292_s3 }
 0x4a0   : > { %2192 = vrot.lane.b32.xlu0 %v2039_v19, %s3293_s23 }
 0x4a3   : > { %v2182_v24 = vpop.f32.mrb[2].mxu0 }
 0x4a4   : > { %2575 = vrot.lane.b32.xlu1 %v2182_v24, %s3292_s3  ;;  %v3045_v25 = vpop.f32.mrb[3].mxu0  ;;  %s3764_s3 = sld [smem:[#allocation16_spill]] }
 0x4a8   : > { %2187 = vrot.lane.b32.xlu1 %v1896_v17, %s3293_s23 }
 0x4ac   : > { %2198 = vrot.lane.b32.xlu1 %v2182_v24, %s3293_s23 }
 0x50a   : > { %v2428_v26 = vpop.permute.xlu0 %2427 }
 0x50b   : > { %3080 = vmatmul.mubr.msk.f32.vlgmr.msra.gmra.mrb[4].mxu0 %vm1193_vm5, %v2428_v26 }
 0x50c   : > { %3140 = vmatpush3.bf16.msra.mxu0 %v3136_v16  ;;  %3086 = vmatprep.mubr.msk.f32.mxu0 %vm3290_vm8, %v3289_v2 }
 0x50d   : > { %3141 = vmatprep.subr.bf16.mxu0 %v3291_v15 }
 0x50e   : > { %v2502_v27 = vpop.permute.xlu0 %2501 }
 0x50f   : > { %3087 = vmatmul.mubr.msk.f32.vlgmr.msra.gmra.mrb[6].mxu0 %vm1193_vm5, %v2502_v27 }
 0x510   : > { %3143 = vmatpush3.bf16.msra.mxu0 %v3136_v16  ;;  %3093 = vmatprep.mubr.msk.f32.mxu0 %vm3290_vm8, %v3289_v2 }
 0x512   : > { %v2193_v29 = vpop.permute.xlu0 %2192 }
 0x513   : > { %v2195_v31 = vmul.f32 %v2193_v29, %v2039_v19 }
 0x516   : > { %v2576_v28 = vpop.permute.xlu1 %2575 }
 0x517   : > { %3094 = vmatmul.mubr.msk.f32.vlgmr.msra.gmra.mrb[8].mxu0 %vm1193_vm5, %v2576_v28 }
 0x51a   : > { %v2188_v30 = vpop.permute.xlu1 %2187 }
 0x51b   : > { %v2190_v32 = vmul.f32 %v2188_v30, %v1896_v17 }
 0x51d   : > { %v2196_v33 = vadd.f32 %v2195_v31, %v2190_v32 }
 0x51e   : > { %v2199_v36 = vpop.permute.xlu1 %2198 }
 0x51f   : > { %v2201_v37 = vmul.f32 %v2199_v36, %v2182_v24 }
 0x521   : > { %v2202_v39 = vadd.f32 %v2201_v37, %v2196_v33 }
 0x523   : > { %3051 = vmatmul.mubr.msk.f32.vlgmr.msra.gmra.mrb[2].mxu1 %vm1193_vm5, %v2202_v39 }
 0x524   : > { %3125 = vmatpush3.bf16.msra.mxu1 %v3124_v38  ;;  %3061 = vmatprep.mubr.msk.f32.mxu1 %vm3290_vm8, %v3289_v2 }
 0x525   : > { %3126 = vmatprep.subr.bf16.mxu1 %v3291_v15 }
 0x528   : > { %3128 = vmatpush3.bf16.msra.mxu1 %v3127_v42 }
 0x529   : > { %3129 = vmatprep.subr.bf16.mxu1 %v3291_v15 }
 0x52b   : > { %3062 = vmatmul.mubr.msk.f32.vlgmr.msra.gmra.mrb[2].mxu1 %vm1267_vm4, %v3461_v3 }
 0x52c   : > { %3131 = vmatpush3.bf16.msra.mxu1 %v3130_v45  ;;  %3072 = vmatprep.mubr.msk.f32.mxu1 %vm3290_vm8, %v3289_v2 }
 0x52d   : > { %3132 = vmatprep.subr.bf16.mxu1 %v3291_v15 }
 0x530   : > { %3134 = vmatpush3.bf16.msra.mxu1 %v3133_v48 }
 0x533   : > { %3073 = vmatmul.mubr.msk.f32.vlgmr.msra.gmra.mrb[2].mxu1 %vm1267_vm4, %v1735_v50 }
 0x5de   : > { %v2497_v51 = vpop.f32.mrb[4].mxu0 }
 0x5df   : > { %v3081_v52 = vpop.f32.mrb[5].mxu0  ;;  %v2649_v54 = vmul.f32 %v2497_v51, %v2497_v51 }
 0x5e2   : > { %v2571_v53 = vpop.f32.mrb[6].mxu0 }
 0x5e3   : > { %v2650_v55 = vmul.f32 %v2571_v53, %v2571_v53  ;;  %v3088_v56 = vpop.f32.mrb[7].mxu0 }
 0x5e5   : > { %v2651_v57 = vadd.f32 %v2650_v55, %v2649_v54 }
 0x5ea   : > { %v2645_v58 = vpop.f32.mrb[8].mxu0 }
 0x5eb   : > { %v2652_v59 = vmul.f32 %v2645_v58, %v2645_v58  ;;  %v3095_v60 = vpop.f32.mrb[9].mxu0 }
 0x5ed   : > { %v2653_v61 = vadd.f32 %v2652_v59, %v2651_v57 }
 0x5ef   : > { %v2654_v62 = vmax.f32 %v2653_v61, 1e-08 }
 0x5f1   : > { %3230 = vrsqrt.f32 %v2654_v62  ;;  %vm2657_vm9 = vcmp.eq.f32.partialorder %v2654_v62, inf  ;;  %v2660_v1 = vand.u32 2147483648, %v2654_v62  ;;  %vm2659_vm10 = vcmp.eq.f32.partialorder %v2654_v62, 0.0 }
 0x5fb   : > { %v3231_v63 = vpop.eup %3230 }
 0x5fc   : > { %v2656_v0 = vmul.f32 %v3231_v63, %v2654_v62 }
 0x5fe   : > { %v2658_v2 = vsel %vm2657_vm9, %v2654_v62, %v2656_v0 }
 0x5ff   : > { %v2661_v4 = vsel %vm2659_vm10, %v2660_v1, %v2658_v2 }
 0x600   : > { %v2863_v5 = vmul.f32 -1.442695, %v2661_v4 }
 0x602   : > { %3232 = vpow2.f32 %v2863_v5 }
 0x606   : > { %v2422_v7 = vpop.f32.mrb[2].mxu1 }
 0x607   : > { %v3150_v10 = vadd.f32 %v2856_v6, %v2422_v7  ;;  %v3074_v12 = vpop.f32.mrb[3].mxu1 }
 0x609   : > { %v2671_v13 = vmax.f32 %v3150_v10, 0.0 }
 0x60b   : > { %v2674_v14 = vsel %vm1267_vm4, %v2671_v13, 0.0 }
 0x60c   : > { %v3233_v15 = vpop.eup %3232  ;;  %2675 = vadd.xlane.f32.xlu0 %v2674_v14 }
 0x60d   : > { %v2665_v16 = vadd.f32 1.0, %v3233_v15 }
 0x60f   : > { %3234 = vrcp.f32 %v2665_v16 }
 0x619   : > { %v3235_v17 = vpop.eup %3234 }
 0x61a   : > { %v2670_v18 = vmul.f32 %v3235_v17, %v2645_v58  ;;  %v2668_v19 = vmul.f32 %v3235_v17, %v2497_v51  ;;  %v2669_v20 = vmul.f32 %v3235_v17, %v2571_v53 }
 0x61c   : > { %v2701_v21 = vmul.f32 %v2668_v19, %v2668_v19  ;;  %v2702_v22 = vmul.f32 %v2669_v20, %v2669_v20  ;;  %v2704_v24 = vmul.f32 %v2670_v18, %v2670_v18 }
 0x61e   : > { %v2703_v23 = vadd.f32 %v2702_v22, %v2701_v21 }
 0x620   : > { %v2705_v25 = vadd.f32 %v2704_v24, %v2703_v23 }
 0x622   : > { %v2706_v26 = vmax.f32 %v2705_v25, 1e-08 }
 0x624   : > { %v2707_v27 = vsel %vm726_vm3, %v2706_v26, 0.0 }
 0x625   : > { %2708 = vadd.xlane.f32.xlu1 %v2707_v27 }
 0x699   : > { %v2676_v28 = vpop.xlane.xlu0 %2675 }
 0x69a   : > { %v2677_v29 = vmul.f32 0.03125, %v2676_v28 }
 0x69c   : > { %v2678_v30 = vsub.f32 %v2671_v13, %v2677_v29 }
 0x69e   : > { %v2679_v31 = vmul.f32 %v2678_v30, %v2678_v30 }
 0x6a0   : > { %v2680_v32 = vsel %vm1267_vm4, %v2679_v31, 0.0 }
 0x6a1   : > { %2681 = vadd.xlane.f32.xlu0 %v2680_v32 }
 0x6b2   : > { %v2709_v33 = vpop.xlane.xlu1 %2708 }
 0x6b3   : > { %v2710_v34 = vmul.f32 0.125, %v2709_v33 }
 0x6b5   : > { %3236 = vrsqrt.f32 %v2710_v34 }
 0x6bf   : > { %v3237_v35 = vpop.eup %3236 }
 0x6c0   : > { %v2713_v36 = vmul.f32 %v3237_v35, %v2669_v20  ;;  %v2712_v37 = vmul.f32 %v3237_v35, %v2668_v19  ;;  %v2714_v40 = vmul.f32 %v3237_v35, %v2670_v18 }
 0x6c2   : > { %v2726_v38 = vadd.f32 %v2713_v36, %v3488_v9  ;;  %v2718_v39 = vadd.f32 %v2712_v37, %v3485_v8  ;;  %v2734_v41 = vadd.f32 %v2714_v40, %v3502_v11  ;;  %v2864_v8 = vld [vmem:[%s3764_s3] ss:$0 sm:$0xff] }
 0x6c3   : > { %v2865_v11 = vld [vmem:[%s3765_s30] ss:$0 sm:$0xff] }
 0x6c4   : > { %2728 = vrot.lane.b32.xlu1 %v2726_v38, %s3294_s26  ;;  %2720 = vrot.lane.b32.xlu0 %v2718_v39, %s3295_s2 }
 0x6c8   : > { %2736 = vrot.lane.b32.xlu1 %v2734_v41, %s3296_s0 }
 0x72e   : > { %v2682_v42 = vpop.xlane.xlu0 %2681 }
 0x72f   : > { %v2683_v43 = vmul.f32 0.03125, %v2682_v42 }
 0x731   : > { %v2684_v44 = vadd.f32 1e-05, %v2683_v43 }
 0x733   : > { %3238 = vrsqrt.f32 %v2684_v44 }
 0x736   : > { %v2729_v47 = vpop.permute.xlu1 %2728  ;;  %v2721_v50 = vpop.permute.xlu0 %2720 }
 0x73a   : > { %v2737_v51 = vpop.permute.xlu1 %2736 }
 0x73d   : > { %v3239_v45 = vpop.eup %3238 }
 0x73e   : > { %v2686_v9 = vmul.f32 %v3239_v45, %v2678_v30 }
 0x740   : > { %v2693_v46 = vmul.f32 %v2864_v8, %v2686_v9 }
 0x742   : > { %v2700_v48 = vadd.f32 %v2865_v11, %v2693_v46 }
 0x744   : > { %v2715_v49 = vadd.f32 %v2700_v48, %v3461_v3 }
 0x746   : > { %2716 = vst.msk [vmem:[%s3447_s27] sm:$0xff] %vm1267_vm4, %v2715_v49 }
 0x747   : > { %2724 = vst.msk [vmem:[%s3447_s27] sm:$0xff] %vm2723_vm11, %v2721_v50 }
 0x748   : > { %2732 = vst.msk [vmem:[%s3447_s27] sm:$0xff] %vm2731_vm12, %v2729_v47 }
 0x749   : > { %2740 = vst.msk [vmem:[%s3447_s27] sm:$0xff] %vm2739_vm13, %v2737_v51 }
 0x74a PF: > { %s3766_s22 = sld [smem:[#allocation6_spill]]  ;;  %s3767_s2 = sld [smem:[#allocation4_spill]] }
 0x74b   : > { %s3768_s25 = sld [smem:[#allocation5_spill]]  ;;  %s3769_s26 = sld [smem:[#allocation7_spill]] }
 0x74c   : > { %s3770_s27 = sld [smem:[#allocation8_spill]] }
 0x750   : > { %s31_s3 = sadd.s32 1, %s3766_s22  }
 0x751   : > { %p28_p9 = scmp.ge.s32.totalorder %s31_s3, 14  }
 0x753   :  { %30 = sbr.rel (!%p28_p9) target bundleno = 10 (0xa), region = 147 }

</bundles_post_ra>
